<compile_context>
chip_gen: v7x
topology: tpu7x:2x2x1
jax: 0.10.0
libtpu: 0.0.40
codegen_flags: <defaults>
</compile_context>

<pallas_src>
import functools

import jax
import jax.numpy as jnp
from jax.experimental import pallas as pl
from jax.experimental.pallas import tpu as pltpu  # noqa: F401  (not needed: single invocation, no scratch)


# ----------------------------- Pallas kernel -----------------------------

def act_decoder_kernel(latent_ref, w_lh_ref, b_lh_ref,
                       w_hh0_ref, b_gates_ref, w_cat_ref,
                       w_out_big_ref, b_out_big_ref,
                       out_ref,
                       *, seq_len, depth, hidden):
    """Whole ActDecoder forward in a single invocation.  Time loop fully
    unrolled; h/c carried as traced values (no scratch, no grid)."""
    H = hidden

    # Load the recurrent weights / biases once; reuse across the unrolled loop.
    w_hh0 = w_hh0_ref[...]                                   # (H, 4H)
    b0 = b_gates_ref[0]                                      # (1, 4H)
    if depth > 1:
        w_cat = [w_cat_ref[l] for l in range(depth - 1)]     # (2H, 4H) each
        b_up = [b_gates_ref[l] for l in range(1, depth)]     # (1, 4H) each

    # latent -> hidden (latent_to_hidden), replicated over layers; c_0 = 0.
    h0 = (jnp.dot(latent_ref[...], w_lh_ref[...],
                  preferred_element_type=jnp.float32) + b_lh_ref[...])
    h = [h0] * depth
    c = [jnp.zeros_like(h0)] * depth

    def lstm_cell(gates, c_prev):
        # PyTorch gate order (i, f, g, o).  Activate the full (B, 4H) tile once
        # with sigmoid and once with tanh, then take lane slices.
        sg = jax.nn.sigmoid(gates)
        tg = jnp.tanh(gates)
        i = sg[:, 0:H]
        f = sg[:, H:2 * H]
        g = tg[:, 2 * H:3 * H]
        o = sg[:, 3 * H:4 * H]
        c_new = f * c_prev + i * g
        h_new = o * jnp.tanh(c_new)
        return h_new, c_new

    tops = []
    for _t in range(seq_len):          # fully unrolled time loop
        # Layer 0: decoder input is identically zero -> recurrent term only.
        gates0 = jnp.dot(h[0], w_hh0, preferred_element_type=jnp.float32) + b0
        h[0], c[0] = lstm_cell(gates0, c[0])
        x = h[0]
        # Layers >= 1: single fused matmul  [h_prev | x] @ [W_hh ; W_ih].
        for l in range(1, depth):
            hx = jnp.concatenate([h[l], x], axis=-1)          # (B, 2H)
            gates = (jnp.dot(hx, w_cat[l - 1],
                             preferred_element_type=jnp.float32) + b_up[l - 1])
            h[l], c[l] = lstm_cell(gates, c[l])
            x = h[l]
        tops.append(x)

    # Hoisted hidden_to_output: lane-concatenate top-layer h over time and do a
    # single matmul against the block-diagonal weight -> lane-dense (B, seq*out).
    top_cat = jnp.concatenate(tops, axis=-1)                  # (B, seq*H)
    out = jax.nn.sigmoid(
        jnp.dot(top_cat, w_out_big_ref[...], preferred_element_type=jnp.float32)
        + b_out_big_ref[...])
    out_ref[...] = out.astype(out_ref.dtype)


def act_decoder_forward(latent, params, *, seq_len, depth, hidden, out_size):
    w_lh, b_lh, w_hh, b_gates, w_ih_up, w_out, b_out = params
    B, _ = latent.shape

    # Fused gate weights for layers >= 1: [W_hh ; W_ih] stacked along K.
    if depth > 1:
        w_cat = jnp.concatenate([w_hh[1:], w_ih_up], axis=1)  # (depth-1, 2H, 4H)
    else:
        # dummy, never read when depth == 1 (avoids a zero-sized input array)
        w_cat = jnp.zeros((1, 2 * hidden, 4 * hidden), jnp.float32)

    # Block-diagonal hidden_to_output weight: one MXU matmul covers every
    # timestep and the result lands lane-dense as (B, seq*out).
    w_out_big = jnp.kron(jnp.eye(seq_len, dtype=w_out.dtype), w_out)  # (seq*H, seq*out)
    b_out_big = jnp.tile(b_out, (1, seq_len))                          # (1, seq*out)

    kernel = functools.partial(act_decoder_kernel, seq_len=seq_len,
                               depth=depth, hidden=hidden)

    # Single invocation, no grid: every operand (total footprint ~200 KB) lives
    # whole in VMEM, so nothing is grid-pipelined / double-buffered, and the
    # output is one lane-dense (B, seq*out) writeback.
    out2d = pl.pallas_call(
        kernel,
        out_shape=jax.ShapeDtypeStruct((B, seq_len * out_size), jnp.float32),
    )(latent, w_lh, b_lh, w_hh[0], b_gates, w_cat, w_out_big, b_out_big)

    # (B, seq*out) -> (seq, B, out): PyTorch's time-major LSTM output layout.
    return out2d.reshape(B, seq_len, out_size).transpose(1, 0, 2)


# ----------------------------- Parameter init -----------------------------

def init_params(key, latent_len, hidden, depth, out_size):
    ks = jax.random.split(key, 8)

    def xavier(k, fan_in, fan_out, shape):
        bound = (6.0 / (fan_in + fan_out)) ** 0.5
        return jax.random.uniform(k, shape, jnp.float32, -bound, bound)

    def lstm_uniform(k, shape):
        bound = 1.0 / (hidden ** 0.5)
        return jax.random.uniform(k, shape, jnp.float32, -bound, bound)

    w_lh = xavier(ks[0], latent_len, hidden, (latent_len, hidden))
    b_lh = lstm_uniform(ks[1], (1, hidden))
    w_hh = lstm_uniform(ks[2], (depth, hidden, 4 * hidden))
    b_gates = lstm_uniform(ks[3], (depth, 1, 4 * hidden))            # b_ih + b_hh combined
    w_ih_up = lstm_uniform(ks[4], (max(depth - 1, 0), hidden, 4 * hidden))  # layers >= 1
    w_out = xavier(ks[5], hidden, out_size, (hidden, out_size))
    b_out = lstm_uniform(ks[6], (1, out_size))
    return (w_lh, b_lh, w_hh, b_gates, w_ih_up, w_out, b_out)


# ----------------------------- Pure-JAX reference -----------------------------

def reference_forward(latent, params, *, seq_len, depth, hidden):
    w_lh, b_lh, w_hh, b_gates, w_ih_up, w_out, b_out = params
    h0 = latent @ w_lh + b_lh
    h = [h0 for _ in range(depth)]
    c = [jnp.zeros_like(h0) for _ in range(depth)]
    outs = []
    for _ in range(seq_len):
        x = None
        for l in range(depth):
            gates = h[l] @ w_hh[l] + b_gates[l]
            if l > 0:
                gates = gates + x @ w_ih_up[l - 1]
            i = jax.nn.sigmoid(gates[:, :hidden])
            f = jax.nn.sigmoid(gates[:, hidden:2 * hidden])
            g = jnp.tanh(gates[:, 2 * hidden:3 * hidden])
            o = jax.nn.sigmoid(gates[:, 3 * hidden:])
            c[l] = f * c[l] + i * g
            h[l] = o * jnp.tanh(c[l])
            x = h[l]
        outs.append(jax.nn.sigmoid(x @ w_out + b_out))
    return jnp.stack(outs)


# ----------------------------- Main -----------------------------

if __name__ == "__main__":
    SEQ = 8        # sequence_length
    BATCH = 8      # batch_size
    HIDDEN = 32    # hidden_size
    DEPTH = 2      # hidden_layer_depth
    LATENT = 16    # latent_length
    OUT = 16       # output_size

    key = jax.random.PRNGKey(0)
    k_lat, k_par = jax.random.split(key)
    latent = jax.random.normal(k_lat, (BATCH, LATENT), jnp.float32)
    params = init_params(k_par, LATENT, HIDDEN, DEPTH, OUT)

    out = act_decoder_forward(latent, params, seq_len=SEQ, depth=DEPTH,
                              hidden=HIDDEN, out_size=OUT)
    out = jax.block_until_ready(out)

    ref = reference_forward(latent, params, seq_len=SEQ, depth=DEPTH,
                            hidden=HIDDEN)
    assert out.shape == (SEQ, BATCH, OUT)
    # f32 kernel vs f32 JAX reference (original module is f64); fused-matmul
    # reassociation keeps differences well below 1e-4 on a sigmoid output.
    assert jnp.allclose(out, ref, atol=1e-4, rtol=1e-4), "mismatch vs JAX reference"

    print("KERNEL_OK")
</pallas_src>

<mosaic_0001>
module attributes {stable_mosaic.version = 11 : i64} {
  func.func @act_decoder_kernel(%arg0: memref<8x16xf32, #tpu.memory_space<vmem>>, %arg1: memref<16x32xf32, #tpu.memory_space<vmem>>, %arg2: memref<1x32xf32, #tpu.memory_space<vmem>>, %arg3: memref<32x128xf32, #tpu.memory_space<vmem>>, %arg4: memref<2x1x128xf32, #tpu.memory_space<vmem>>, %arg5: memref<1x64x128xf32, #tpu.memory_space<vmem>>, %arg6: memref<256x128xf32, #tpu.memory_space<vmem>>, %arg7: memref<1x128xf32, #tpu.memory_space<vmem>>, %arg8: memref<8x128xf32, #tpu.memory_space<vmem>>) attributes {dimension_semantics = [], scalar_prefetch = 0 : i64, scratch_operands = 0 : i64, tpu.core_type = #tpu.core_type<tc>} {
    %c0 = arith.constant 0 : index
    %c0_0 = arith.constant 0 : index
    %0 = vector.load %arg3[%c0, %c0_0] : memref<32x128xf32, #tpu.memory_space<vmem>>, vector<32x128xf32>
    %c0_1 = arith.constant 0 : index
    %c0_2 = arith.constant 0 : index
    %c0_3 = arith.constant 0 : index
    %1 = vector.load %arg4[%c0_1, %c0_2, %c0_3] : memref<2x1x128xf32, #tpu.memory_space<vmem>>, vector<1x1x128xf32>
    %2 = vector.shape_cast %1 : vector<1x1x128xf32> to vector<1x128xf32>
    %c0_4 = arith.constant 0 : index
    %c0_5 = arith.constant 0 : index
    %c0_6 = arith.constant 0 : index
    %3 = vector.load %arg5[%c0_4, %c0_5, %c0_6] : memref<1x64x128xf32, #tpu.memory_space<vmem>>, vector<1x64x128xf32>
    %4 = vector.shape_cast %3 : vector<1x64x128xf32> to vector<64x128xf32>
    %c1 = arith.constant 1 : index
    %c0_7 = arith.constant 0 : index
    %c0_8 = arith.constant 0 : index
    %5 = vector.load %arg4[%c1, %c0_7, %c0_8] : memref<2x1x128xf32, #tpu.memory_space<vmem>>, vector<1x1x128xf32>
    %6 = vector.shape_cast %5 : vector<1x1x128xf32> to vector<1x128xf32>
    %c0_9 = arith.constant 0 : index
    %c0_10 = arith.constant 0 : index
    %7 = vector.load %arg0[%c0_9, %c0_10] : memref<8x16xf32, #tpu.memory_space<vmem>>, vector<8x16xf32>
    %c0_11 = arith.constant 0 : index
    %c0_12 = arith.constant 0 : index
    %8 = vector.load %arg1[%c0_11, %c0_12] : memref<16x32xf32, #tpu.memory_space<vmem>>, vector<16x32xf32>
    %cst = arith.constant dense<0.000000e+00> : vector<8x32xf32>
    %9 = tpu.matmul %7, %8, %cst {dimension_numbers = #tpu.dot_dimension_numbers<[1], [0], [0], [1], [0, 0, 1, 1], [], []>} : vector<8x16xf32>, vector<16x32xf32>, vector<8x32xf32> -> vector<8x32xf32>
    %c0_13 = arith.constant 0 : index
    %c0_14 = arith.constant 0 : index
    %10 = vector.load %arg2[%c0_13, %c0_14] : memref<1x32xf32, #tpu.memory_space<vmem>>, vector<1x32xf32>
    %11 = vector.broadcast %10 : vector<1x32xf32> to vector<8x32xf32>
    %12 = arith.addf %9, %11 : vector<8x32xf32>
    %cst_15 = arith.constant 0.000000e+00 : f32
    %13 = vector.broadcast %cst_15 : f32 to vector<8x32xf32>
    %cst_16 = arith.constant dense<0.000000e+00> : vector<8x128xf32>
    %14 = tpu.matmul %12, %0, %cst_16 {dimension_numbers = #tpu.dot_dimension_numbers<[1], [0], [0], [1], [0, 0, 1, 1], [], []>} : vector<8x32xf32>, vector<32x128xf32>, vector<8x128xf32> -> vector<8x128xf32>
    %15 = vector.broadcast %2 : vector<1x128xf32> to vector<8x128xf32>
    %16 = arith.addf %14, %15 : vector<8x128xf32>
    %17 = arith.negf %16 : vector<8x128xf32>
    %18 = math.exp %17 : vector<8x128xf32>
    %cst_17 = arith.constant 1.000000e+00 : f32
    %19 = vector.broadcast %cst_17 : f32 to vector<8x128xf32>
    %20 = arith.addf %19, %18 : vector<8x128xf32>
    %21 = arith.divf %19, %20 : vector<8x128xf32>
    %22 = math.tanh %16 : vector<8x128xf32>
    %23 = vector.extract_strided_slice %21 {offsets = [0, 0], sizes = [8, 32], strides = [1, 1]} : vector<8x128xf32> to vector<8x32xf32>
    %24 = vector.extract_strided_slice %21 {offsets = [0, 32], sizes = [8, 32], strides = [1, 1]} : vector<8x128xf32> to vector<8x32xf32>
    %25 = vector.extract_strided_slice %22 {offsets = [0, 64], sizes = [8, 32], strides = [1, 1]} : vector<8x128xf32> to vector<8x32xf32>
    %26 = vector.extract_strided_slice %21 {offsets = [0, 96], sizes = [8, 32], strides = [1, 1]} : vector<8x128xf32> to vector<8x32xf32>
    %27 = arith.mulf %24, %13 : vector<8x32xf32>
    %28 = arith.mulf %23, %25 : vector<8x32xf32>
    %29 = arith.addf %27, %28 : vector<8x32xf32>
    %30 = math.tanh %29 : vector<8x32xf32>
    %31 = arith.mulf %26, %30 : vector<8x32xf32>
    %32 = tpu.concatenate %12, %31 in 1 : vector<8x32xf32>, vector<8x32xf32> -> vector<8x64xf32>
    %cst_18 = arith.constant dense<0.000000e+00> : vector<8x128xf32>
    %33 = tpu.matmul %32, %4, %cst_18 {dimension_numbers = #tpu.dot_dimension_numbers<[1], [0], [0], [1], [0, 0, 1, 1], [], []>} : vector<8x64xf32>, vector<64x128xf32>, vector<8x128xf32> -> vector<8x128xf32>
    %34 = vector.broadcast %6 : vector<1x128xf32> to vector<8x128xf32>
    %35 = arith.addf %33, %34 : vector<8x128xf32>
    %36 = arith.negf %35 : vector<8x128xf32>
    %37 = math.exp %36 : vector<8x128xf32>
    %cst_19 = arith.constant 1.000000e+00 : f32
    %38 = vector.broadcast %cst_19 : f32 to vector<8x128xf32>
    %39 = arith.addf %38, %37 : vector<8x128xf32>
    %40 = arith.divf %38, %39 : vector<8x128xf32>
    %41 = math.tanh %35 : vector<8x128xf32>
    %42 = vector.extract_strided_slice %40 {offsets = [0, 0], sizes = [8, 32], strides = [1, 1]} : vector<8x128xf32> to vector<8x32xf32>
    %43 = vector.extract_strided_slice %40 {offsets = [0, 32], sizes = [8, 32], strides = [1, 1]} : vector<8x128xf32> to vector<8x32xf32>
    %44 = vector.extract_strided_slice %41 {offsets = [0, 64], sizes = [8, 32], strides = [1, 1]} : vector<8x128xf32> to vector<8x32xf32>
    %45 = vector.extract_strided_slice %40 {offsets = [0, 96], sizes = [8, 32], strides = [1, 1]} : vector<8x128xf32> to vector<8x32xf32>
    %46 = arith.mulf %43, %13 : vector<8x32xf32>
    %47 = arith.mulf %42, %44 : vector<8x32xf32>
    %48 = arith.addf %46, %47 : vector<8x32xf32>
    %49 = math.tanh %48 : vector<8x32xf32>
    %50 = arith.mulf %45, %49 : vector<8x32xf32>
    %cst_20 = arith.constant dense<0.000000e+00> : vector<8x128xf32>
    %51 = tpu.matmul %31, %0, %cst_20 {dimension_numbers = #tpu.dot_dimension_numbers<[1], [0], [0], [1], [0, 0, 1, 1], [], []>} : vector<8x32xf32>, vector<32x128xf32>, vector<8x128xf32> -> vector<8x128xf32>
    %52 = vector.broadcast %2 : vector<1x128xf32> to vector<8x128xf32>
    %53 = arith.addf %51, %52 : vector<8x128xf32>
    %54 = arith.negf %53 : vector<8x128xf32>
    %55 = math.exp %54 : vector<8x128xf32>
    %cst_21 = arith.constant 1.000000e+00 : f32
    %56 = vector.broadcast %cst_21 : f32 to vector<8x128xf32>
    %57 = arith.addf %56, %55 : vector<8x128xf32>
    %58 = arith.divf %56, %57 : vector<8x128xf32>
    %59 = math.tanh %53 : vector<8x128xf32>
    %60 = vector.extract_strided_slice %58 {offsets = [0, 0], sizes = [8, 32], strides = [1, 1]} : vector<8x128xf32> to vector<8x32xf32>
    %61 = vector.extract_strided_slice %58 {offsets = [0, 32], sizes = [8, 32], strides = [1, 1]} : vector<8x128xf32> to vector<8x32xf32>
    %62 = vector.extract_strided_slice %59 {offsets = [0, 64], sizes = [8, 32], strides = [1, 1]} : vector<8x128xf32> to vector<8x32xf32>
    %63 = vector.extract_strided_slice %58 {offsets = [0, 96], sizes = [8, 32], strides = [1, 1]} : vector<8x128xf32> to vector<8x32xf32>
    %64 = arith.mulf %61, %29 : vector<8x32xf32>
    %65 = arith.mulf %60, %62 : vector<8x32xf32>
    %66 = arith.addf %64, %65 : vector<8x32xf32>
    %67 = math.tanh %66 : vector<8x32xf32>
    %68 = arith.mulf %63, %67 : vector<8x32xf32>
    %69 = tpu.concatenate %50, %68 in 1 : vector<8x32xf32>, vector<8x32xf32> -> vector<8x64xf32>
    %cst_22 = arith.constant dense<0.000000e+00> : vector<8x128xf32>
    %70 = tpu.matmul %69, %4, %cst_22 {dimension_numbers = #tpu.dot_dimension_numbers<[1], [0], [0], [1], [0, 0, 1, 1], [], []>} : vector<8x64xf32>, vector<64x128xf32>, vector<8x128xf32> -> vector<8x128xf32>
    %71 = vector.broadcast %6 : vector<1x128xf32> to vector<8x128xf32>
    %72 = arith.addf %70, %71 : vector<8x128xf32>
    %73 = arith.negf %72 : vector<8x128xf32>
    %74 = math.exp %73 : vector<8x128xf32>
    %cst_23 = arith.constant 1.000000e+00 : f32
    %75 = vector.broadcast %cst_23 : f32 to vector<8x128xf32>
    %76 = arith.addf %75, %74 : vector<8x128xf32>
    %77 = arith.divf %75, %76 : vector<8x128xf32>
    %78 = math.tanh %72 : vector<8x128xf32>
    %79 = vector.extract_strided_slice %77 {offsets = [0, 0], sizes = [8, 32], strides = [1, 1]} : vector<8x128xf32> to vector<8x32xf32>
    %80 = vector.extract_strided_slice %77 {offsets = [0, 32], sizes = [8, 32], strides = [1, 1]} : vector<8x128xf32> to vector<8x32xf32>
    %81 = vector.extract_strided_slice %78 {offsets = [0, 64], sizes = [8, 32], strides = [1, 1]} : vector<8x128xf32> to vector<8x32xf32>
    %82 = vector.extract_strided_slice %77 {offsets = [0, 96], sizes = [8, 32], strides = [1, 1]} : vector<8x128xf32> to vector<8x32xf32>
    %83 = arith.mulf %80, %48 : vector<8x32xf32>
    %84 = arith.mulf %79, %81 : vector<8x32xf32>
    %85 = arith.addf %83, %84 : vector<8x32xf32>
    %86 = math.tanh %85 : vector<8x32xf32>
    %87 = arith.mulf %82, %86 : vector<8x32xf32>
    %cst_24 = arith.constant dense<0.000000e+00> : vector<8x128xf32>
    %88 = tpu.matmul %68, %0, %cst_24 {dimension_numbers = #tpu.dot_dimension_numbers<[1], [0], [0], [1], [0, 0, 1, 1], [], []>} : vector<8x32xf32>, vector<32x128xf32>, vector<8x128xf32> -> vector<8x128xf32>
    %89 = vector.broadcast %2 : vector<1x128xf32> to vector<8x128xf32>
    %90 = arith.addf %88, %89 : vector<8x128xf32>
    %91 = arith.negf %90 : vector<8x128xf32>
    %92 = math.exp %91 : vector<8x128xf32>
    %cst_25 = arith.constant 1.000000e+00 : f32
    %93 = vector.broadcast %cst_25 : f32 to vector<8x128xf32>
    %94 = arith.addf %93, %92 : vector<8x128xf32>
    %95 = arith.divf %93, %94 : vector<8x128xf32>
    %96 = math.tanh %90 : vector<8x128xf32>
    %97 = vector.extract_strided_slice %95 {offsets = [0, 0], sizes = [8, 32], strides = [1, 1]} : vector<8x128xf32> to vector<8x32xf32>
    %98 = vector.extract_strided_slice %95 {offsets = [0, 32], sizes = [8, 32], strides = [1, 1]} : vector<8x128xf32> to vector<8x32xf32>
    %99 = vector.extract_strided_slice %96 {offsets = [0, 64], sizes = [8, 32], strides = [1, 1]} : vector<8x128xf32> to vector<8x32xf32>
    %100 = vector.extract_strided_slice %95 {offsets = [0, 96], sizes = [8, 32], strides = [1, 1]} : vector<8x128xf32> to vector<8x32xf32>
    %101 = arith.mulf %98, %66 : vector<8x32xf32>
    %102 = arith.mulf %97, %99 : vector<8x32xf32>
    %103 = arith.addf %101, %102 : vector<8x32xf32>
    %104 = math.tanh %103 : vector<8x32xf32>
    %105 = arith.mulf %100, %104 : vector<8x32xf32>
    %106 = tpu.concatenate %87, %105 in 1 : vector<8x32xf32>, vector<8x32xf32> -> vector<8x64xf32>
    %cst_26 = arith.constant dense<0.000000e+00> : vector<8x128xf32>
    %107 = tpu.matmul %106, %4, %cst_26 {dimension_numbers = #tpu.dot_dimension_numbers<[1], [0], [0], [1], [0, 0, 1, 1], [], []>} : vector<8x64xf32>, vector<64x128xf32>, vector<8x128xf32> -> vector<8x128xf32>
    %108 = vector.broadcast %6 : vector<1x128xf32> to vector<8x128xf32>
    %109 = arith.addf %107, %108 : vector<8x128xf32>
    %110 = arith.negf %109 : vector<8x128xf32>
    %111 = math.exp %110 : vector<8x128xf32>
    %cst_27 = arith.constant 1.000000e+00 : f32
    %112 = vector.broadcast %cst_27 : f32 to vector<8x128xf32>
    %113 = arith.addf %112, %111 : vector<8x128xf32>
    %114 = arith.divf %112, %113 : vector<8x128xf32>
    %115 = math.tanh %109 : vector<8x128xf32>
    %116 = vector.extract_strided_slice %114 {offsets = [0, 0], sizes = [8, 32], strides = [1, 1]} : vector<8x128xf32> to vector<8x32xf32>
    %117 = vector.extract_strided_slice %114 {offsets = [0, 32], sizes = [8, 32], strides = [1, 1]} : vector<8x128xf32> to vector<8x32xf32>
    %118 = vector.extract_strided_slice %115 {offsets = [0, 64], sizes = [8, 32], strides = [1, 1]} : vector<8x128xf32> to vector<8x32xf32>
    %119 = vector.extract_strided_slice %114 {offsets = [0, 96], sizes = [8, 32], strides = [1, 1]} : vector<8x128xf32> to vector<8x32xf32>
    %120 = arith.mulf %117, %85 : vector<8x32xf32>
    %121 = arith.mulf %116, %118 : vector<8x32xf32>
    %122 = arith.addf %120, %121 : vector<8x32xf32>
    %123 = math.tanh %122 : vector<8x32xf32>
    %124 = arith.mulf %119, %123 : vector<8x32xf32>
    %cst_28 = arith.constant dense<0.000000e+00> : vector<8x128xf32>
    %125 = tpu.matmul %105, %0, %cst_28 {dimension_numbers = #tpu.dot_dimension_numbers<[1], [0], [0], [1], [0, 0, 1, 1], [], []>} : vector<8x32xf32>, vector<32x128xf32>, vector<8x128xf32> -> vector<8x128xf32>
    %126 = vector.broadcast %2 : vector<1x128xf32> to vector<8x128xf32>
    %127 = arith.addf %125, %126 : vector<8x128xf32>
    %128 = arith.negf %127 : vector<8x128xf32>
    %129 = math.exp %128 : vector<8x128xf32>
    %cst_29 = arith.constant 1.000000e+00 : f32
    %130 = vector.broadcast %cst_29 : f32 to vector<8x128xf32>
    %131 = arith.addf %130, %129 : vector<8x128xf32>
    %132 = arith.divf %130, %131 : vector<8x128xf32>
    %133 = math.tanh %127 : vector<8x128xf32>
    %134 = vector.extract_strided_slice %132 {offsets = [0, 0], sizes = [8, 32], strides = [1, 1]} : vector<8x128xf32> to vector<8x32xf32>
    %135 = vector.extract_strided_slice %132 {offsets = [0, 32], sizes = [8, 32], strides = [1, 1]} : vector<8x128xf32> to vector<8x32xf32>
    %136 = vector.extract_strided_slice %133 {offsets = [0, 64], sizes = [8, 32], strides = [1, 1]} : vector<8x128xf32> to vector<8x32xf32>
    %137 = vector.extract_strided_slice %132 {offsets = [0, 96], sizes = [8, 32], strides = [1, 1]} : vector<8x128xf32> to vector<8x32xf32>
    %138 = arith.mulf %135, %103 : vector<8x32xf32>
    %139 = arith.mulf %134, %136 : vector<8x32xf32>
    %140 = arith.addf %138, %139 : vector<8x32xf32>
    %141 = math.tanh %140 : vector<8x32xf32>
    %142 = arith.mulf %137, %141 : vector<8x32xf32>
    %143 = tpu.concatenate %124, %142 in 1 : vector<8x32xf32>, vector<8x32xf32> -> vector<8x64xf32>
    %cst_30 = arith.constant dense<0.000000e+00> : vector<8x128xf32>
    %144 = tpu.matmul %143, %4, %cst_30 {dimension_numbers = #tpu.dot_dimension_numbers<[1], [0], [0], [1], [0, 0, 1, 1], [], []>} : vector<8x64xf32>, vector<64x128xf32>, vector<8x128xf32> -> vector<8x128xf32>
    %145 = vector.broadcast %6 : vector<1x128xf32> to vector<8x128xf32>
    %146 = arith.addf %144, %145 : vector<8x128xf32>
    %147 = arith.negf %146 : vector<8x128xf32>
    %148 = math.exp %147 : vector<8x128xf32>
    %cst_31 = arith.constant 1.000000e+00 : f32
    %149 = vector.broadcast %cst_31 : f32 to vector<8x128xf32>
    %150 = arith.addf %149, %148 : vector<8x128xf32>
    %151 = arith.divf %149, %150 : vector<8x128xf32>
    %152 = math.tanh %146 : vector<8x128xf32>
    %153 = vector.extract_strided_slice %151 {offsets = [0, 0], sizes = [8, 32], strides = [1, 1]} : vector<8x128xf32> to vector<8x32xf32>
    %154 = vector.extract_strided_slice %151 {offsets = [0, 32], sizes = [8, 32], strides = [1, 1]} : vector<8x128xf32> to vector<8x32xf32>
    %155 = vector.extract_strided_slice %152 {offsets = [0, 64], sizes = [8, 32], strides = [1, 1]} : vector<8x128xf32> to vector<8x32xf32>
    %156 = vector.extract_strided_slice %151 {offsets = [0, 96], sizes = [8, 32], strides = [1, 1]} : vector<8x128xf32> to vector<8x32xf32>
    %157 = arith.mulf %154, %122 : vector<8x32xf32>
    %158 = arith.mulf %153, %155 : vector<8x32xf32>
    %159 = arith.addf %157, %158 : vector<8x32xf32>
    %160 = math.tanh %159 : vector<8x32xf32>
    %161 = arith.mulf %156, %160 : vector<8x32xf32>
    %cst_32 = arith.constant dense<0.000000e+00> : vector<8x128xf32>
    %162 = tpu.matmul %142, %0, %cst_32 {dimension_numbers = #tpu.dot_dimension_numbers<[1], [0], [0], [1], [0, 0, 1, 1], [], []>} : vector<8x32xf32>, vector<32x128xf32>, vector<8x128xf32> -> vector<8x128xf32>
    %163 = vector.broadcast %2 : vector<1x128xf32> to vector<8x128xf32>
    %164 = arith.addf %162, %163 : vector<8x128xf32>
    %165 = arith.negf %164 : vector<8x128xf32>
    %166 = math.exp %165 : vector<8x128xf32>
    %cst_33 = arith.constant 1.000000e+00 : f32
    %167 = vector.broadcast %cst_33 : f32 to vector<8x128xf32>
    %168 = arith.addf %167, %166 : vector<8x128xf32>
    %169 = arith.divf %167, %168 : vector<8x128xf32>
    %170 = math.tanh %164 : vector<8x128xf32>
    %171 = vector.extract_strided_slice %169 {offsets = [0, 0], sizes = [8, 32], strides = [1, 1]} : vector<8x128xf32> to vector<8x32xf32>
    %172 = vector.extract_strided_slice %169 {offsets = [0, 32], sizes = [8, 32], strides = [1, 1]} : vector<8x128xf32> to vector<8x32xf32>
    %173 = vector.extract_strided_slice %170 {offsets = [0, 64], sizes = [8, 32], strides = [1, 1]} : vector<8x128xf32> to vector<8x32xf32>
    %174 = vector.extract_strided_slice %169 {offsets = [0, 96], sizes = [8, 32], strides = [1, 1]} : vector<8x128xf32> to vector<8x32xf32>
    %175 = arith.mulf %172, %140 : vector<8x32xf32>
    %176 = arith.mulf %171, %173 : vector<8x32xf32>
    %177 = arith.addf %175, %176 : vector<8x32xf32>
    %178 = math.tanh %177 : vector<8x32xf32>
    %179 = arith.mulf %174, %178 : vector<8x32xf32>
    %180 = tpu.concatenate %161, %179 in 1 : vector<8x32xf32>, vector<8x32xf32> -> vector<8x64xf32>
    %cst_34 = arith.constant dense<0.000000e+00> : vector<8x128xf32>
    %181 = tpu.matmul %180, %4, %cst_34 {dimension_numbers = #tpu.dot_dimension_numbers<[1], [0], [0], [1], [0, 0, 1, 1], [], []>} : vector<8x64xf32>, vector<64x128xf32>, vector<8x128xf32> -> vector<8x128xf32>
    %182 = vector.broadcast %6 : vector<1x128xf32> to vector<8x128xf32>
    %183 = arith.addf %181, %182 : vector<8x128xf32>
    %184 = arith.negf %183 : vector<8x128xf32>
    %185 = math.exp %184 : vector<8x128xf32>
    %cst_35 = arith.constant 1.000000e+00 : f32
    %186 = vector.broadcast %cst_35 : f32 to vector<8x128xf32>
    %187 = arith.addf %186, %185 : vector<8x128xf32>
    %188 = arith.divf %186, %187 : vector<8x128xf32>
    %189 = math.tanh %183 : vector<8x128xf32>
    %190 = vector.extract_strided_slice %188 {offsets = [0, 0], sizes = [8, 32], strides = [1, 1]} : vector<8x128xf32> to vector<8x32xf32>
    %191 = vector.extract_strided_slice %188 {offsets = [0, 32], sizes = [8, 32], strides = [1, 1]} : vector<8x128xf32> to vector<8x32xf32>
    %192 = vector.extract_strided_slice %189 {offsets = [0, 64], sizes = [8, 32], strides = [1, 1]} : vector<8x128xf32> to vector<8x32xf32>
    %193 = vector.extract_strided_slice %188 {offsets = [0, 96], sizes = [8, 32], strides = [1, 1]} : vector<8x128xf32> to vector<8x32xf32>
    %194 = arith.mulf %191, %159 : vector<8x32xf32>
    %195 = arith.mulf %190, %192 : vector<8x32xf32>
    %196 = arith.addf %194, %195 : vector<8x32xf32>
    %197 = math.tanh %196 : vector<8x32xf32>
    %198 = arith.mulf %193, %197 : vector<8x32xf32>
    %cst_36 = arith.constant dense<0.000000e+00> : vector<8x128xf32>
    %199 = tpu.matmul %179, %0, %cst_36 {dimension_numbers = #tpu.dot_dimension_numbers<[1], [0], [0], [1], [0, 0, 1, 1], [], []>} : vector<8x32xf32>, vector<32x128xf32>, vector<8x128xf32> -> vector<8x128xf32>
    %200 = vector.broadcast %2 : vector<1x128xf32> to vector<8x128xf32>
    %201 = arith.addf %199, %200 : vector<8x128xf32>
    %202 = arith.negf %201 : vector<8x128xf32>
    %203 = math.exp %202 : vector<8x128xf32>
    %cst_37 = arith.constant 1.000000e+00 : f32
    %204 = vector.broadcast %cst_37 : f32 to vector<8x128xf32>
    %205 = arith.addf %204, %203 : vector<8x128xf32>
    %206 = arith.divf %204, %205 : vector<8x128xf32>
    %207 = math.tanh %201 : vector<8x128xf32>
    %208 = vector.extract_strided_slice %206 {offsets = [0, 0], sizes = [8, 32], strides = [1, 1]} : vector<8x128xf32> to vector<8x32xf32>
    %209 = vector.extract_strided_slice %206 {offsets = [0, 32], sizes = [8, 32], strides = [1, 1]} : vector<8x128xf32> to vector<8x32xf32>
    %210 = vector.extract_strided_slice %207 {offsets = [0, 64], sizes = [8, 32], strides = [1, 1]} : vector<8x128xf32> to vector<8x32xf32>
    %211 = vector.extract_strided_slice %206 {offsets = [0, 96], sizes = [8, 32], strides = [1, 1]} : vector<8x128xf32> to vector<8x32xf32>
    %212 = arith.mulf %209, %177 : vector<8x32xf32>
    %213 = arith.mulf %208, %210 : vector<8x32xf32>
    %214 = arith.addf %212, %213 : vector<8x32xf32>
    %215 = math.tanh %214 : vector<8x32xf32>
    %216 = arith.mulf %211, %215 : vector<8x32xf32>
    %217 = tpu.concatenate %198, %216 in 1 : vector<8x32xf32>, vector<8x32xf32> -> vector<8x64xf32>
    %cst_38 = arith.constant dense<0.000000e+00> : vector<8x128xf32>
    %218 = tpu.matmul %217, %4, %cst_38 {dimension_numbers = #tpu.dot_dimension_numbers<[1], [0], [0], [1], [0, 0, 1, 1], [], []>} : vector<8x64xf32>, vector<64x128xf32>, vector<8x128xf32> -> vector<8x128xf32>
    %219 = vector.broadcast %6 : vector<1x128xf32> to vector<8x128xf32>
    %220 = arith.addf %218, %219 : vector<8x128xf32>
    %221 = arith.negf %220 : vector<8x128xf32>
    %222 = math.exp %221 : vector<8x128xf32>
    %cst_39 = arith.constant 1.000000e+00 : f32
    %223 = vector.broadcast %cst_39 : f32 to vector<8x128xf32>
    %224 = arith.addf %223, %222 : vector<8x128xf32>
    %225 = arith.divf %223, %224 : vector<8x128xf32>
    %226 = math.tanh %220 : vector<8x128xf32>
    %227 = vector.extract_strided_slice %225 {offsets = [0, 0], sizes = [8, 32], strides = [1, 1]} : vector<8x128xf32> to vector<8x32xf32>
    %228 = vector.extract_strided_slice %225 {offsets = [0, 32], sizes = [8, 32], strides = [1, 1]} : vector<8x128xf32> to vector<8x32xf32>
    %229 = vector.extract_strided_slice %226 {offsets = [0, 64], sizes = [8, 32], strides = [1, 1]} : vector<8x128xf32> to vector<8x32xf32>
    %230 = vector.extract_strided_slice %225 {offsets = [0, 96], sizes = [8, 32], strides = [1, 1]} : vector<8x128xf32> to vector<8x32xf32>
    %231 = arith.mulf %228, %196 : vector<8x32xf32>
    %232 = arith.mulf %227, %229 : vector<8x32xf32>
    %233 = arith.addf %231, %232 : vector<8x32xf32>
    %234 = math.tanh %233 : vector<8x32xf32>
    %235 = arith.mulf %230, %234 : vector<8x32xf32>
    %cst_40 = arith.constant dense<0.000000e+00> : vector<8x128xf32>
    %236 = tpu.matmul %216, %0, %cst_40 {dimension_numbers = #tpu.dot_dimension_numbers<[1], [0], [0], [1], [0, 0, 1, 1], [], []>} : vector<8x32xf32>, vector<32x128xf32>, vector<8x128xf32> -> vector<8x128xf32>
    %237 = vector.broadcast %2 : vector<1x128xf32> to vector<8x128xf32>
    %238 = arith.addf %236, %237 : vector<8x128xf32>
    %239 = arith.negf %238 : vector<8x128xf32>
    %240 = math.exp %239 : vector<8x128xf32>
    %cst_41 = arith.constant 1.000000e+00 : f32
    %241 = vector.broadcast %cst_41 : f32 to vector<8x128xf32>
    %242 = arith.addf %241, %240 : vector<8x128xf32>
    %243 = arith.divf %241, %242 : vector<8x128xf32>
    %244 = math.tanh %238 : vector<8x128xf32>
    %245 = vector.extract_strided_slice %243 {offsets = [0, 0], sizes = [8, 32], strides = [1, 1]} : vector<8x128xf32> to vector<8x32xf32>
    %246 = vector.extract_strided_slice %243 {offsets = [0, 32], sizes = [8, 32], strides = [1, 1]} : vector<8x128xf32> to vector<8x32xf32>
    %247 = vector.extract_strided_slice %244 {offsets = [0, 64], sizes = [8, 32], strides = [1, 1]} : vector<8x128xf32> to vector<8x32xf32>
    %248 = vector.extract_strided_slice %243 {offsets = [0, 96], sizes = [8, 32], strides = [1, 1]} : vector<8x128xf32> to vector<8x32xf32>
    %249 = arith.mulf %246, %214 : vector<8x32xf32>
    %250 = arith.mulf %245, %247 : vector<8x32xf32>
    %251 = arith.addf %249, %250 : vector<8x32xf32>
    %252 = math.tanh %251 : vector<8x32xf32>
    %253 = arith.mulf %248, %252 : vector<8x32xf32>
    %254 = tpu.concatenate %235, %253 in 1 : vector<8x32xf32>, vector<8x32xf32> -> vector<8x64xf32>
    %cst_42 = arith.constant dense<0.000000e+00> : vector<8x128xf32>
    %255 = tpu.matmul %254, %4, %cst_42 {dimension_numbers = #tpu.dot_dimension_numbers<[1], [0], [0], [1], [0, 0, 1, 1], [], []>} : vector<8x64xf32>, vector<64x128xf32>, vector<8x128xf32> -> vector<8x128xf32>
    %256 = vector.broadcast %6 : vector<1x128xf32> to vector<8x128xf32>
    %257 = arith.addf %255, %256 : vector<8x128xf32>
    %258 = arith.negf %257 : vector<8x128xf32>
    %259 = math.exp %258 : vector<8x128xf32>
    %cst_43 = arith.constant 1.000000e+00 : f32
    %260 = vector.broadcast %cst_43 : f32 to vector<8x128xf32>
    %261 = arith.addf %260, %259 : vector<8x128xf32>
    %262 = arith.divf %260, %261 : vector<8x128xf32>
    %263 = math.tanh %257 : vector<8x128xf32>
    %264 = vector.extract_strided_slice %262 {offsets = [0, 0], sizes = [8, 32], strides = [1, 1]} : vector<8x128xf32> to vector<8x32xf32>
    %265 = vector.extract_strided_slice %262 {offsets = [0, 32], sizes = [8, 32], strides = [1, 1]} : vector<8x128xf32> to vector<8x32xf32>
    %266 = vector.extract_strided_slice %263 {offsets = [0, 64], sizes = [8, 32], strides = [1, 1]} : vector<8x128xf32> to vector<8x32xf32>
    %267 = vector.extract_strided_slice %262 {offsets = [0, 96], sizes = [8, 32], strides = [1, 1]} : vector<8x128xf32> to vector<8x32xf32>
    %268 = arith.mulf %265, %233 : vector<8x32xf32>
    %269 = arith.mulf %264, %266 : vector<8x32xf32>
    %270 = arith.addf %268, %269 : vector<8x32xf32>
    %271 = math.tanh %270 : vector<8x32xf32>
    %272 = arith.mulf %267, %271 : vector<8x32xf32>
    %cst_44 = arith.constant dense<0.000000e+00> : vector<8x128xf32>
    %273 = tpu.matmul %253, %0, %cst_44 {dimension_numbers = #tpu.dot_dimension_numbers<[1], [0], [0], [1], [0, 0, 1, 1], [], []>} : vector<8x32xf32>, vector<32x128xf32>, vector<8x128xf32> -> vector<8x128xf32>
    %274 = vector.broadcast %2 : vector<1x128xf32> to vector<8x128xf32>
    %275 = arith.addf %273, %274 : vector<8x128xf32>
    %276 = arith.negf %275 : vector<8x128xf32>
    %277 = math.exp %276 : vector<8x128xf32>
    %cst_45 = arith.constant 1.000000e+00 : f32
    %278 = vector.broadcast %cst_45 : f32 to vector<8x128xf32>
    %279 = arith.addf %278, %277 : vector<8x128xf32>
    %280 = arith.divf %278, %279 : vector<8x128xf32>
    %281 = math.tanh %275 : vector<8x128xf32>
    %282 = vector.extract_strided_slice %280 {offsets = [0, 0], sizes = [8, 32], strides = [1, 1]} : vector<8x128xf32> to vector<8x32xf32>
    %283 = vector.extract_strided_slice %280 {offsets = [0, 32], sizes = [8, 32], strides = [1, 1]} : vector<8x128xf32> to vector<8x32xf32>
    %284 = vector.extract_strided_slice %281 {offsets = [0, 64], sizes = [8, 32], strides = [1, 1]} : vector<8x128xf32> to vector<8x32xf32>
    %285 = vector.extract_strided_slice %280 {offsets = [0, 96], sizes = [8, 32], strides = [1, 1]} : vector<8x128xf32> to vector<8x32xf32>
    %286 = arith.mulf %283, %251 : vector<8x32xf32>
    %287 = arith.mulf %282, %284 : vector<8x32xf32>
    %288 = arith.addf %286, %287 : vector<8x32xf32>
    %289 = math.tanh %288 : vector<8x32xf32>
    %290 = arith.mulf %285, %289 : vector<8x32xf32>
    %291 = tpu.concatenate %272, %290 in 1 : vector<8x32xf32>, vector<8x32xf32> -> vector<8x64xf32>
    %cst_46 = arith.constant dense<0.000000e+00> : vector<8x128xf32>
    %292 = tpu.matmul %291, %4, %cst_46 {dimension_numbers = #tpu.dot_dimension_numbers<[1], [0], [0], [1], [0, 0, 1, 1], [], []>} : vector<8x64xf32>, vector<64x128xf32>, vector<8x128xf32> -> vector<8x128xf32>
    %293 = vector.broadcast %6 : vector<1x128xf32> to vector<8x128xf32>
    %294 = arith.addf %292, %293 : vector<8x128xf32>
    %295 = arith.negf %294 : vector<8x128xf32>
    %296 = math.exp %295 : vector<8x128xf32>
    %cst_47 = arith.constant 1.000000e+00 : f32
    %297 = vector.broadcast %cst_47 : f32 to vector<8x128xf32>
    %298 = arith.addf %297, %296 : vector<8x128xf32>
    %299 = arith.divf %297, %298 : vector<8x128xf32>
    %300 = math.tanh %294 : vector<8x128xf32>
    %301 = vector.extract_strided_slice %299 {offsets = [0, 0], sizes = [8, 32], strides = [1, 1]} : vector<8x128xf32> to vector<8x32xf32>
    %302 = vector.extract_strided_slice %299 {offsets = [0, 32], sizes = [8, 32], strides = [1, 1]} : vector<8x128xf32> to vector<8x32xf32>
    %303 = vector.extract_strided_slice %300 {offsets = [0, 64], sizes = [8, 32], strides = [1, 1]} : vector<8x128xf32> to vector<8x32xf32>
    %304 = vector.extract_strided_slice %299 {offsets = [0, 96], sizes = [8, 32], strides = [1, 1]} : vector<8x128xf32> to vector<8x32xf32>
    %305 = arith.mulf %302, %270 : vector<8x32xf32>
    %306 = arith.mulf %301, %303 : vector<8x32xf32>
    %307 = arith.addf %305, %306 : vector<8x32xf32>
    %308 = math.tanh %307 : vector<8x32xf32>
    %309 = arith.mulf %304, %308 : vector<8x32xf32>
    %310 = tpu.concatenate %50, %87, %124, %161, %198, %235, %272, %309 in 1 : vector<8x32xf32>, vector<8x32xf32>, vector<8x32xf32>, vector<8x32xf32>, vector<8x32xf32>, vector<8x32xf32>, vector<8x32xf32>, vector<8x32xf32> -> vector<8x256xf32>
    %c0_48 = arith.constant 0 : index
    %c0_49 = arith.constant 0 : index
    %311 = vector.load %arg6[%c0_48, %c0_49] : memref<256x128xf32, #tpu.memory_space<vmem>>, vector<256x128xf32>
    %cst_50 = arith.constant dense<0.000000e+00> : vector<8x128xf32>
    %312 = tpu.matmul %310, %311, %cst_50 {dimension_numbers = #tpu.dot_dimension_numbers<[1], [0], [0], [1], [0, 0, 1, 1], [], []>} : vector<8x256xf32>, vector<256x128xf32>, vector<8x128xf32> -> vector<8x128xf32>
    %c0_51 = arith.constant 0 : index
    %c0_52 = arith.constant 0 : index
    %313 = vector.load %arg7[%c0_51, %c0_52] : memref<1x128xf32, #tpu.memory_space<vmem>>, vector<1x128xf32>
    %314 = vector.broadcast %313 : vector<1x128xf32> to vector<8x128xf32>
    %315 = arith.addf %312, %314 : vector<8x128xf32>
    %316 = arith.negf %315 : vector<8x128xf32>
    %317 = math.exp %316 : vector<8x128xf32>
    %cst_53 = arith.constant 1.000000e+00 : f32
    %318 = vector.broadcast %cst_53 : f32 to vector<8x128xf32>
    %319 = arith.addf %318, %317 : vector<8x128xf32>
    %320 = arith.divf %318, %319 : vector<8x128xf32>
    %c0_54 = arith.constant 0 : index
    %c0_55 = arith.constant 0 : index
    %321 = vector.load %arg8[%c0_54, %c0_55] : memref<8x128xf32, #tpu.memory_space<vmem>>, vector<8x128xf32>
    tpu.vector_store %arg8[%c0_54, %c0_55], %320 {strides = array<i32>} : memref<8x128xf32, #tpu.memory_space<vmem>>, vector<8x128xf32>,
    return
  }
}

</mosaic_0001>

<bundles_post_ra>
// kernel: tpu_custom_call.1
= control target key start
LH: loop header
LB: loop body
LE: loop exit
PB: predicated region body
PF: predicated region fallthrough
CT: control target
= control target key end

     0   :  { %13 = vsyncpa [#allocation3], 0  ;;  %s3393_s0 = inlined_call_operand.hbm [shape: f32[8,16], index: 0, kind: input, shape index: {}]   ;;  %s3394_s1 = inlined_call_operand.hbm [shape: f32[16,32], index: 1, kind: input, shape index: {}]   ;;  %s3395_s2 = inlined_call_operand.vmem [shape: f32[1,32], index: 2, kind: input, shape index: {}]   ;;  %s3396_s3 = inlined_call_operand.hbm [shape: f32[32,128], index: 3, kind: input, shape index: {}]   ;;  %s3397_s4 = inlined_call_operand.vmem [shape: f32[2,1,128], index: 4, kind: input, shape index: {}]   ;;  %s3398_s5 = inlined_call_operand.hbm [shape: f32[1,64,128], index: 5, kind: input, shape index: {}]   ;;  %s3399_s6 = inlined_call_operand.hbm [shape: f32[256,128], index: 6, kind: input, shape index: {}]   ;;  %s3400_s7 = inlined_call_operand.vmem [shape: f32[1,128], index: 7, kind: input, shape index: {}]   ;;  %s3401_s8 = inlined_call_operand.hbm [shape: f32[8,128], index: 8, kind: output, shape index: {}]  }
   0x1   :  { %14 = vsyncpa [#allocation6], 0 }
   0x2   :  { %15 = vsyncpa [#allocation9], 0 }
   0x3   :  { %16 = vsyncpa [#allocation4], 0  ;;  %s2899_s27 = smov [#allocation5]   ;;  %s2759_s9 = scalar_lea.hbm %s3394_s1, 256 }
   0x4   :  { %s32_s28 = sshll.u32 %s2899_s27, 4  ;;  %p2760_p0 = scmp.ne.s32.totalorder %s3394_s1, %s2759_s9  ;;  %s33_s28 = int_to_ptr.vmem [resolvable:$true] %s32_s28 }
   0x5   :  { %p2763_p1 = scmp.lt.u32.totalorder %s2759_s9, %s3394_s1 }
   0x7   :  { %p2765_p2 = pnand %p2763_p1, %p2760_p0 }
   0x9   :  { %2768 = shalt.err (!%p2765_p2)
}
   0xa   :  { %s2769_s14 = scalar_lea.vmem %s33_s28, 256  ;;  %p2774_p4 = scmp.lt.s32.totalorder %s33_s28, %s33_s28 }
   0xb   :  { %p2770_p3 = scmp.ne.s32.totalorder %s33_s28, %s2769_s14  ;;  %p2775_p5 = scmp.lt.s32.totalorder %s2769_s14, %s2769_s14 }
   0xd   :  { %p2776_p6 = por %p2775_p5, %p2774_p4 }
   0xf   :  { %p2777_p7 = pnand %p2776_p6, %p2770_p3 }
  0x11   :  { %2780 = shalt.err (!%p2777_p7)
}
  0x12   :  { %s2900_s15 = smov 128   ;;  %s2901_s16 = smov 8  }
  0x13   :  { %38 = dma.hbm_to_vmem [thread:$0]  %s3394_s1, 256, %s33_s28, [#allocation6], %s2900_s15, %s2900_s15, %s2901_s16  }
  0x14   :  { %s2902_s19 = smov [#allocation8]   ;;  %s2903_s21 = smov [#allocation2]  }
  0x15   :  { %s60_s20 = sshll.u32 %s2902_s19, 4  ;;  %s23_s22 = sshll.u32 %s2903_s21, 4  ;;  %s61_s20 = int_to_ptr.vmem [resolvable:$true] %s60_s20  ;;  %s24_s22 = int_to_ptr.vmem [resolvable:$true] %s23_s22 }
  0x16   :  { %s2781_s25 = scalar_lea.hbm %s3398_s5, 1024 }
  0x17   :  { %p2782_p8 = scmp.ne.s32.totalorder %s3398_s5, %s2781_s25  ;;  %p2785_p9 = scmp.lt.u32.totalorder %s2781_s25, %s3398_s5 }
  0x19   :  { %p2787_p10 = pnand %p2785_p9, %p2782_p8 }
  0x1b   :  { %2790 = shalt.err (!%p2787_p10)
}
  0x1c   :  { %s2791_s1 = scalar_lea.vmem %s61_s20, 1024  ;;  %p2796_p12 = scmp.lt.s32.totalorder %s61_s20, %s61_s20 }
  0x1d   :  { %p2792_p11 = scmp.ne.s32.totalorder %s61_s20, %s2791_s1  ;;  %p2797_p13 = scmp.lt.s32.totalorder %s2791_s1, %s2791_s1 }
  0x1f   :  { %p2798_p0 = por %p2797_p13, %p2796_p12 }
  0x21   :  { %p2799_p1 = pnand %p2798_p0, %p2792_p11 }
  0x23   :  { %2802 = shalt.err (!%p2799_p1)
}
  0x24   :  { %66 = dma.hbm_to_vmem [thread:$0]  %s3398_s5, 1024, %s61_s20, [#allocation9], %s2900_s15, %s2900_s15, %s2901_s16  }
  0x25   :  { %s2803_s12 = scalar_lea.hbm %s3393_s0, 128 }
  0x26   :  { %p2804_p2 = scmp.ne.s32.totalorder %s3393_s0, %s2803_s12  ;;  %p2807_p3 = scmp.lt.u32.totalorder %s2803_s12, %s3393_s0 }
  0x28   :  { %p2809_p4 = pnand %p2807_p3, %p2804_p2 }
  0x2a   :  { %2812 = shalt.err (!%p2809_p4)
}
  0x2b   :  { %s2813_s19 = scalar_lea.vmem %s24_s22, 128  ;;  %p2818_p6 = scmp.lt.s32.totalorder %s24_s22, %s24_s22 }
  0x2c   :  { %p2814_p5 = scmp.ne.s32.totalorder %s24_s22, %s2813_s19  ;;  %p2819_p7 = scmp.lt.s32.totalorder %s2813_s19, %s2813_s19 }
  0x2e   :  { %p2820_p8 = por %p2819_p7, %p2818_p6 }
  0x30   :  { %p2821_p9 = pnand %p2820_p8, %p2814_p5 }
  0x32   :  { %2824 = shalt.err (!%p2821_p9)
}
  0x33   :  { %26 = dma.hbm_to_vmem [thread:$0]  %s3393_s0, 128, %s24_s22, [#allocation3]  }
  0x34   :  { %s2904_s21 = smov [#allocation7]   ;;  %s2905_s24 = smov [#allocation10]  }
  0x35   :  { %s46_s23 = sshll.u32 %s2904_s21, 4  ;;  %s72_s25 = sshll.u32 %s2905_s24, 4  ;;  %s47_s23 = int_to_ptr.vmem [resolvable:$true] %s46_s23  ;;  %s73_s25 = int_to_ptr.vmem [resolvable:$true] %s72_s25 }
  0x36   :  { %s2825_s29 = scalar_lea.hbm %s3396_s3, 512 }
  0x37   :  { %p2826_p10 = scmp.ne.s32.totalorder %s3396_s3, %s2825_s29  ;;  %p2829_p11 = scmp.lt.u32.totalorder %s2825_s29, %s3396_s3 }
  0x39   :  { %p2831_p12 = pnand %p2829_p11, %p2826_p10 }
  0x3b   :  { %2834 = shalt.err (!%p2831_p12)
}
  0x3c   :  { %s2835_s0 = scalar_lea.vmem %s47_s23, 512  ;;  %p2840_p0 = scmp.lt.s32.totalorder %s47_s23, %s47_s23 }
  0x3d   :  { %p2836_p13 = scmp.ne.s32.totalorder %s47_s23, %s2835_s0  ;;  %p2841_p1 = scmp.lt.s32.totalorder %s2835_s0, %s2835_s0 }
  0x3f   :  { %p2842_p2 = por %p2841_p1, %p2840_p0 }
  0x41   :  { %p2843_p3 = pnand %p2842_p2, %p2836_p13 }
  0x43   :  { %2846 = shalt.err (!%p2843_p3)
}
  0x44   :  { %52 = dma.hbm_to_vmem [thread:$0]  %s3396_s3, 512, %s47_s23, [#allocation6], %s2900_s15, %s2900_s15, %s2901_s16  }
  0x45   :  { %s2847_s13 = scalar_lea.hbm %s3399_s6, 4096 }
  0x46   :  { %p2848_p4 = scmp.ne.s32.totalorder %s3399_s6, %s2847_s13  ;;  %p2851_p5 = scmp.lt.u32.totalorder %s2847_s13, %s3399_s6 }
  0x48   :  { %p2853_p6 = pnand %p2851_p5, %p2848_p4 }
  0x4a   :  { %2856 = shalt.err (!%p2853_p6)
}
  0x4b   :  { %s2857_s5 = scalar_lea.vmem %s73_s25, 4096  ;;  %p2862_p8 = scmp.lt.s32.totalorder %s73_s25, %s73_s25 }
  0x4c   :  { %p2858_p7 = scmp.ne.s32.totalorder %s73_s25, %s2857_s5  ;;  %p2863_p9 = scmp.lt.s32.totalorder %s2857_s5, %s2857_s5 }
  0x4e   :  { %p2864_p10 = por %p2863_p9, %p2862_p8 }
  0x50   :  { %p2865_p11 = pnand %p2864_p10, %p2858_p7 }
  0x52   :  { %2868 = shalt.err (!%p2865_p11)
}
  0x53   :  { %78 = dma.hbm_to_vmem [thread:$0]  %s3399_s6, 4096, %s73_s25, [#allocation9], %s2900_s15, %s2900_s15, %s2901_s16  }
  0x54   :  { %2891 = dma.done.wait [#allocation3], 128  }
  0x55   :  { %2892 = vsyncadd [#allocation3], 4294967168 }
  0x56   :  { %2893 = dma.done.wait [#allocation6], 768  }
  0x57   :  { %2894 = vsyncadd [#allocation6], 4294966528 }
  0x58   :  { %2895 = dma.done.wait [#allocation9], 5120  }
  0x59   :  { %2896 = vsyncadd [#allocation9], 4294962176  ;;  %v2906_v0 = vmov 0.0|0.0   ;;  %vm2907_vm0 = vmmov 0   ;;  %v2908_v1 = vmov 0.0   ;;  %v112_v2 = vld [vmem:[#allocation5] sm:$0xff] }
  0x5a   :  { %2424 = vmatprep.subr.bf16.mxu0 %v2906_v0  ;;  %2181 = vmatprep.mubr.msk.f32.mxu0 %vm2907_vm0, %v2908_v1  ;;  %v113_v3 = vld [vmem:[#allocation5 + $0x8] sm:$0xff]  ;;  %v96_v5 = vld [vmem:[#allocation7] sm:$0xff]  ;;  %v97_v6 = vld [vmem:[#allocation7 + $0x8] sm:$0xff]  ;;  %vm121_vm1 = vcmask 130048   ;;  %vm201_vm2 = vcmask 261120   ;;  %s2910_s23 = smov 32  }
  0x5b   :  { %2427 = vmatprep.subr.bf16.mxu1 %v2906_v0  ;;  %2192 = vmatprep.mubr.msk.f32.mxu1 %vm2907_vm0, %v2908_v1  ;;  %v2425_v4 = vpack.c.bf16 %v113_v3, %v112_v2  ;;  %v3036_v7 = vpack.c.bf16 %v97_v6, %v96_v5  ;;  %v111_v8 = vld [vmem:[#allocation2] sm:$0xff]  ;;  %v98_v9 = vld [vmem:[#allocation7 + $0x10] sm:$0xff]  ;;  %v99_v10 = vld [vmem:[#allocation7 + $0x18] sm:$0xff]  ;;  %vm310_vm3 = vcmask 523264   ;;  %vm1850_vm4 = vcmask 785408   ;;  %s2912_s29 = smov [#allocation11]  }
  0x5c   :  { %v3043_v11 = vpack.c.bf16 %v99_v10, %v98_v9  ;;  %v1989_v12 = vld [vmem:[%s3395_s2] ss:$0 sm:$0xff]  ;;  %s2909_s2 = smov 64   ;;  %v101_v30 = vld [vmem:[#allocation8] sm:$0xff]  ;;  %v103_v32 = vld [vmem:[#allocation8 + $0x10] sm:$0xff]  ;;  %s1977_s30 = sshll.u32 %s2912_s29, 4  ;;  %s1978_s30 = int_to_ptr.vmem [resolvable:$true] %s1977_s30 }
  0x5d   :  { %2426 = vmatpush3.bf16.msra.mxu0 %v2425_v4  ;;  %2429 = vmatpush3.bf16.msra.mxu1 %v3036_v7  ;;  %v3060_v16 = vld [vmem:[%s3397_s4] ss:$0 sm:$0xff]  ;;  %v104_v34 = vld [vmem:[#allocation8 + $0x18] sm:$0xff]  ;;  %v105_v36 = vld [vmem:[#allocation8 + $0x20] sm:$0xff]  ;;  %s2869_s1 = scalar_lea.vmem %s1978_s30, 128  ;;  %p2874_p13 = scmp.lt.s32.totalorder %s1978_s30, %s1978_s30 }
  0x5e   :  { %2433 = vmatprep.subr.bf16.mxu0 %v2906_v0  ;;  %2430 = vmatprep.subr.bf16.mxu1 %v2906_v0  ;;  %v102_v31 = vld [vmem:[#allocation8 + $0x8] sm:$0xff]  ;;  %v3071_v35 = vpack.c.bf16 %v104_v34, %v103_v32  ;;  %v107_v39 = vld [vmem:[#allocation8 + $0x30] sm:$0xff]  ;;  %v108_v40 = vld [vmem:[#allocation8 + $0x38] sm:$0xff]  ;;  %p2870_p12 = scmp.ne.s32.totalorder %s1978_s30, %s2869_s1  ;;  %p2875_p0 = scmp.lt.s32.totalorder %s2869_s1, %s2869_s1 }
  0x5f   :  { %v3068_v33 = vpack.c.bf16 %v102_v31, %v101_v30  ;;  %v106_v37 = vld [vmem:[#allocation8 + $0x28] sm:$0xff]  ;;  %v3080_v42 = vpack.c.bf16 %v108_v40, %v107_v39 }
  0x60   :  { %2182 = vmatmul.mubr.msk.f32.vlgmr.msra.gmra.mrb[0].mxu0 %vm121_vm1, %v111_v8  ;;  %v3075_v38 = vpack.c.bf16 %v106_v37, %v105_v36  ;;  %v3113_v48 = vld [vmem:[%s3397_s4 + $0x1] ss:$0 sm:$0xff]  ;;  %s2911_s4 = smov 96   ;;  %p2876_p1 = por %p2875_p0, %p2874_p13 }
  0x61   :  { %2211 = vmatprep.mubr.msk.f32.mxu0 %vm2907_vm0, %v2908_v1  ;;  %2432 = vmatpush3.bf16.msra.mxu1 %v3043_v11 }
  0x62   :  { %2445 = vmatprep.subr.bf16.mxu1 %v2906_v0  ;;  %2435 = vmatpush3.bf16.msra.mxu0 %v3068_v33  ;;  %p2877_p2 = pnand %p2876_p1, %p2870_p12 }
  0x63   :  { %2436 = vmatprep.subr.bf16.mxu0 %v2906_v0 }
  0x66   :  { %2438 = vmatpush3.bf16.msra.mxu0 %v3071_v35 }
  0x67   :  { %2439 = vmatprep.subr.bf16.mxu0 %v2906_v0 }
  0x6a   :  { %2441 = vmatpush3.bf16.msra.mxu0 %v3075_v38 }
  0x6b   :  { %2442 = vmatprep.subr.bf16.mxu0 %v2906_v0 }
  0x6e   :  { %2444 = vmatpush3.bf16.msra.mxu0 %v3080_v42 }
  0x6f   :  { %2469 = vmatprep.subr.bf16.mxu0 %v2906_v0 }
 0x133   :  { %v191_v13 = vpop.f32.mrb[0].mxu0 }
 0x134   :  { %v192_v14 = vadd.f32 %v1989_v12, %v191_v13  ;;  %v2183_v15 = vpop.f32.mrb[1].mxu0 }
 0x136   :  { %2193 = vmatmul.mubr.msk.f32.vlgmr.msra.gmra.mrb[0].mxu1 %vm201_vm2, %v192_v14 }
 0x137   :  { %2447 = vmatpush3.bf16.msra.mxu1 %v3036_v7  ;;  %2222 = vmatprep.mubr.msk.f32.mxu1 %vm2907_vm0, %v2908_v1 }
 0x138   :  { %2448 = vmatprep.subr.bf16.mxu1 %v2906_v0 }
 0x13b   :  { %2450 = vmatpush3.bf16.msra.mxu1 %v3043_v11 }
 0x13c   :  { %2451 = vmatprep.subr.bf16.mxu1 %v2906_v0 }
 0x209   :  { %v271_v17 = vpop.f32.mrb[0].mxu1 }
 0x20a   :  { %v272_v18 = vadd.f32 %v3060_v16, %v271_v17  ;;  %v2194_v19 = vpop.f32.mrb[1].mxu1 }
 0x20c   :  { %2627 = vtanh.f32 %v272_v18  ;;  %v1993_v21 = vmul.f32 -1.442695, %v272_v18 }
 0x20e   :  { %2629 = vpow2.f32 %v1993_v21 }
 0x216   :  { %v2628_v20 = vpop.eup %2627 }
 0x217   :  { %284 = vrot.lane.b32.xlu0 %v2628_v20, %s2909_s2 }
 0x218   :  { %v2630_v22 = vpop.eup %2629 }
 0x219   :  { %v278_v23 = vadd.f32 1.0, %v2630_v22 }
 0x21b   :  { %2631 = vrcp.f32 %v278_v23 }
 0x225   :  { %v2632_v24 = vpop.eup %2631 }
 0x226   :  { %v282_v27 = vmul.f32 0.0, %v2632_v24 }
 0x289   :  { %v285_v25 = vpop.permute.xlu0 %284 }
 0x28a   :  { %v287_v26 = vmul.f32 %v2632_v24, %v285_v25 }
 0x28c   :  { %289 = vrot.lane.b32.xlu0 %v287_v26, %s2910_s23 }
 0x2fe   :  { %v290_v28 = vpop.permute.xlu0 %289 }
 0x2ff   :  { %v3065_v29 = vadd.f32 %v290_v28, %v282_v27 }
 0x301   :  { %2633 = vtanh.f32 %v3065_v29 }
 0x30b   :  { %v2634_v41 = vpop.eup %2633 }
 0x30c   :  { %295 = vrot.lane.b32.xlu1 %v2634_v41, %s2909_s2 }
 0x37e   :  { %v296_v43 = vpop.permute.xlu1 %295 }
 0x37f   :  { %v298_v44 = vmul.f32 %v2632_v24, %v296_v43 }
 0x381   :  { %408 = vrot.lane.b32.xlu0 %v298_v44, %s2910_s23  ;;  %300 = vrot.lane.b32.xlu1 %v298_v44, %s2909_s2 }
 0x3f3   :  { %v409_v45 = vpop.permute.xlu0 %408  ;;  %v301_v46 = vpop.permute.xlu1 %300 }
 0x3f4   :  { %v303_v47 = vsel %vm201_vm2, %v192_v14, %v301_v46  ;;  %2223 = vmatmul.mubr.msk.f32.vlgmr.msra.gmra.mrb[2].mxu1 %vm201_vm2, %v409_v45 }
 0x3f5   :  { %2212 = vmatmul.mubr.msk.f32.vlgmr.msra.gmra.mrb[2].mxu0 %vm310_vm3, %v303_v47  ;;  %2453 = vmatpush3.bf16.msra.mxu1 %v3068_v33 }
 0x3f6   :  { %2454 = vmatprep.subr.bf16.mxu1 %v2906_v0  ;;  %2241 = vmatprep.mubr.msk.f32.mxu1 %vm2907_vm0, %v2908_v1 }
 0x3f7   :  { %2471 = vmatpush3.bf16.msra.mxu0 %v3068_v33  ;;  %2271 = vmatprep.mubr.msk.f32.mxu0 %vm2907_vm0, %v2908_v1 }
 0x3f8   :  { %2472 = vmatprep.subr.bf16.mxu0 %v2906_v0 }
 0x3f9   :  { %2456 = vmatpush3.bf16.msra.mxu1 %v3071_v35 }
 0x3fa   :  { %2457 = vmatprep.subr.bf16.mxu1 %v2906_v0 }
 0x3fb   :  { %2474 = vmatpush3.bf16.msra.mxu0 %v3071_v35 }
 0x3fc   :  { %2475 = vmatprep.subr.bf16.mxu0 %v2906_v0 }
 0x3fd   :  { %2459 = vmatpush3.bf16.msra.mxu1 %v3075_v38 }
 0x3fe   :  { %2460 = vmatprep.subr.bf16.mxu1 %v2906_v0 }
 0x3ff   :  { %2477 = vmatpush3.bf16.msra.mxu0 %v3075_v38 }
 0x400   :  { %2478 = vmatprep.subr.bf16.mxu0 %v2906_v0 }
 0x401   :  { %2462 = vmatpush3.bf16.msra.mxu1 %v3080_v42 }
 0x402   :  { %2463 = vmatprep.subr.bf16.mxu1 %v2906_v0 }
 0x403   :  { %2480 = vmatpush3.bf16.msra.mxu0 %v3080_v42 }
 0x404   :  { %2499 = vmatprep.subr.bf16.mxu0 %v2906_v0 }
 0x4c7   :  { %v478_v49 = vpop.f32.mrb[2].mxu1 }
 0x4c8   :  { %v479_v50 = vadd.f32 %v3060_v16, %v478_v49  ;;  %v380_v51 = vpop.f32.mrb[2].mxu0  ;;  %v2224_v52 = vpop.f32.mrb[3].mxu1 }
 0x4c9   :  { %v381_v53 = vadd.f32 %v3113_v48, %v380_v51  ;;  %v2213_v54 = vpop.f32.mrb[3].mxu0 }
 0x4ca   :  { %2635 = vtanh.f32 %v479_v50  ;;  %v1998_v57 = vmul.f32 -1.442695, %v479_v50 }
 0x4cb   :  { %2637 = vtanh.f32 %v381_v53  ;;  %v1996_v58 = vmul.f32 -1.442695, %v381_v53 }
 0x4cc   :  { %2639 = vpow2.f32 %v1998_v57 }
 0x4cd   :  { %2641 = vpow2.f32 %v1996_v58 }
 0x4d4   :  { %v2636_v55 = vpop.eup %2635 }
 0x4d5   :  { %v2638_v56 = vpop.eup %2637  ;;  %491 = vrot.lane.b32.xlu0 %v2636_v55, %s2909_s2 }
 0x4d6   :  { %393 = vrot.lane.b32.xlu1 %v2638_v56, %s2909_s2  ;;  %v2640_v59 = vpop.eup %2639 }
 0x4d7   :  { %v2642_v60 = vpop.eup %2641  ;;  %v485_v61 = vadd.f32 1.0, %v2640_v59 }
 0x4d8   :  { %v387_v62 = vadd.f32 1.0, %v2642_v60 }
 0x4d9   :  { %2643 = vrcp.f32 %v485_v61 }
 0x4da   :  { %2645 = vrcp.f32 %v387_v62 }
 0x4e3   :  { %v2644_v63 = vpop.eup %2643 }
 0x4e4   :  { %v2646_v3 = vpop.eup %2645  ;;  %v489_v8 = vmul.f32 %v2644_v63, %v3065_v29 }
 0x4e5   :  { %v391_v10 = vmul.f32 0.0, %v2646_v3 }
 0x547   :  { %v492_v2 = vpop.permute.xlu0 %491 }
 0x548   :  { %v494_v4 = vmul.f32 %v2644_v63, %v492_v2  ;;  %v394_v5 = vpop.permute.xlu1 %393 }
 0x549   :  { %v396_v6 = vmul.f32 %v2646_v3, %v394_v5 }
 0x54a   :  { %496 = vrot.lane.b32.xlu0 %v494_v4, %s2910_s23 }
 0x54b   :  { %398 = vrot.lane.b32.xlu1 %v396_v6, %s2910_s23 }
 0x5bc   :  { %v497_v9 = vpop.permute.xlu0 %496 }
 0x5bd   :  { %v3122_v12 = vadd.f32 %v497_v9, %v489_v8  ;;  %v399_v13 = vpop.permute.xlu1 %398 }
 0x5be   :  { %v401_v14 = vadd.f32 %v399_v13, %v391_v10 }
 0x5bf   :  { %2647 = vtanh.f32 %v3122_v12 }
 0x5c0   :  { %2649 = vtanh.f32 %v401_v14 }
 0x5c9   :  { %v2648_v15 = vpop.eup %2647 }
 0x5ca   :  { %v2650_v17 = vpop.eup %2649  ;;  %502 = vrot.lane.b32.xlu0 %v2648_v15, %s2909_s2 }
 0x5cb   :  { %404 = vrot.lane.b32.xlu1 %v2650_v17, %s2909_s2 }
 0x63c   :  { %v503_v18 = vpop.permute.xlu0 %502 }
 0x63d   :  { %v505_v19 = vmul.f32 %v2644_v63, %v503_v18  ;;  %v405_v20 = vpop.permute.xlu1 %404 }
 0x63e   :  { %v407_v21 = vmul.f32 %v2646_v3, %v405_v20 }
 0x63f   :  { %511 = vrot.lane.b32.xlu0 %v505_v19, %s2909_s2 }
 0x640   :  { %507 = vrot.lane.b32.xlu1 %v407_v21, %s2910_s23 }
 0x644   :  { %612 = vrot.lane.b32.xlu1 %v505_v19, %s2910_s23 }
 0x6b1   :  { %v512_v22 = vpop.permute.xlu0 %511 }
 0x6b2   :  { %v3130_v23 = vpop.permute.xlu1 %507 }
 0x6b3   :  { %v514_v24 = vsel %vm201_vm2, %v3130_v23, %v512_v22 }
 0x6b4   :  { %2242 = vmatmul.mubr.msk.f32.vlgmr.msra.gmra.mrb[4].mxu1 %vm310_vm3, %v514_v24 }
 0x6b5   :  { %2465 = vmatpush3.bf16.msra.mxu1 %v3036_v7  ;;  %2252 = vmatprep.mubr.msk.f32.mxu1 %vm2907_vm0, %v2908_v1 }
 0x6b6   :  { %2466 = vmatprep.subr.bf16.mxu1 %v2906_v0  ;;  %v613_v25 = vpop.permute.xlu1 %612 }
 0x6b9   :  { %2468 = vmatpush3.bf16.msra.mxu1 %v3043_v11 }
 0x6ba   :  { %2481 = vmatprep.subr.bf16.mxu1 %v2906_v0 }
 0x6bc   :  { %2253 = vmatmul.mubr.msk.f32.vlgmr.msra.gmra.mrb[6].mxu1 %vm201_vm2, %v613_v25 }
 0x6bd   :  { %2483 = vmatpush3.bf16.msra.mxu1 %v3036_v7  ;;  %2282 = vmatprep.mubr.msk.f32.mxu1 %vm2907_vm0, %v2908_v1 }
 0x6be   :  { %2484 = vmatprep.subr.bf16.mxu1 %v2906_v0 }
 0x6c1   :  { %2486 = vmatpush3.bf16.msra.mxu1 %v3043_v11 }
 0x6c2   :  { %2487 = vmatprep.subr.bf16.mxu1 %v2906_v0 }
 0x787   :  { %v584_v26 = vpop.f32.mrb[4].mxu1 }
 0x788   :  { %v585_v27 = vadd.f32 %v3113_v48, %v584_v26  ;;  %v2243_v28 = vpop.f32.mrb[5].mxu1 }
 0x78a   :  { %2651 = vtanh.f32 %v585_v27  ;;  %v2000_v36 = vmul.f32 -1.442695, %v585_v27 }
 0x78f   :  { %v682_v29 = vpop.f32.mrb[6].mxu1 }
 0x790   :  { %v683_v30 = vadd.f32 %v3060_v16, %v682_v29  ;;  %v2254_v31 = vpop.f32.mrb[7].mxu1 }
 0x792   :  { %2653 = vtanh.f32 %v683_v30  ;;  %v2002_v37 = vmul.f32 -1.442695, %v683_v30 }
 0x793   :  { %2655 = vpow2.f32 %v2000_v36 }
 0x794   :  { %v2652_v32 = vpop.eup %2651  ;;  %2657 = vpow2.f32 %v2002_v37 }
 0x795   :  { %597 = vrot.lane.b32.xlu0 %v2652_v32, %s2909_s2 }
 0x79c   :  { %v2654_v34 = vpop.eup %2653 }
 0x79d   :  { %695 = vrot.lane.b32.xlu1 %v2654_v34, %s2909_s2  ;;  %v2656_v39 = vpop.eup %2655 }
 0x79e   :  { %v591_v40 = vadd.f32 1.0, %v2656_v39  ;;  %v2658_v41 = vpop.eup %2657 }
 0x79f   :  { %v689_v43 = vadd.f32 1.0, %v2658_v41 }
 0x7a0   :  { %2659 = vrcp.f32 %v591_v40 }
 0x7a1   :  { %2661 = vrcp.f32 %v689_v43 }
 0x7aa   :  { %v2660_v44 = vpop.eup %2659 }
 0x7ab   :  { %v2662_v47 = vpop.eup %2661  ;;  %v595_v51 = vmul.f32 %v2660_v44, %v401_v14 }
 0x7ac   :  { %v693_v54 = vmul.f32 %v2662_v47, %v3122_v12 }
 0x807   :  { %v598_v45 = vpop.permute.xlu0 %597 }
 0x808   :  { %v600_v46 = vmul.f32 %v2660_v44, %v598_v45 }
 0x80a   :  { %602 = vrot.lane.b32.xlu0 %v600_v46, %s2910_s23 }
 0x80f   :  { %v696_v49 = vpop.permute.xlu1 %695 }
 0x810   :  { %v698_v50 = vmul.f32 %v2662_v47, %v696_v49 }
 0x812   :  { %700 = vrot.lane.b32.xlu1 %v698_v50, %s2910_s23 }
 0x87c   :  { %v603_v52 = vpop.permute.xlu0 %602 }
 0x87d   :  { %v3154_v53 = vadd.f32 %v603_v52, %v595_v51 }
 0x87f   :  { %2663 = vtanh.f32 %v3154_v53 }
 0x884   :  { %v701_v55 = vpop.permute.xlu1 %700 }
 0x885   :  { %v3158_v56 = vadd.f32 %v701_v55, %v693_v54 }
 0x887   :  { %2665 = vtanh.f32 %v3158_v56 }
 0x889   :  { %v2664_v57 = vpop.eup %2663 }
 0x88a   :  { %608 = vrot.lane.b32.xlu0 %v2664_v57, %s2909_s2 }
 0x891   :  { %v2666_v58 = vpop.eup %2665 }
 0x892   :  { %706 = vrot.lane.b32.xlu1 %v2666_v58, %s2909_s2 }
 0x8fc   :  { %v609_v59 = vpop.permute.xlu0 %608 }
 0x8fd   :  { %v3163_v60 = vmul.f32 %v2660_v44, %v609_v59 }
 0x8ff   :  { %711 = vrot.lane.b32.xlu0 %v3163_v60, %s2910_s23 }
 0x904   :  { %v707_v61 = vpop.permute.xlu1 %706 }
 0x905   :  { %v709_v62 = vmul.f32 %v2662_v47, %v707_v61 }
 0x907   :  { %816 = vrot.lane.b32.xlu0 %v709_v62, %s2910_s23  ;;  %715 = vrot.lane.b32.xlu1 %v709_v62, %s2909_s2 }
 0x971   :  { %v712_v63 = vpop.permute.xlu0 %711 }
 0x979   :  { %v817_v2 = vpop.permute.xlu0 %816  ;;  %v716_v3 = vpop.permute.xlu1 %715 }
 0x97a   :  { %v718_v4 = vsel %vm201_vm2, %v712_v63, %v716_v3  ;;  %2283 = vmatmul.mubr.msk.f32.vlgmr.msra.gmra.mrb[8].mxu1 %vm201_vm2, %v817_v2 }
 0x97b   :  { %2272 = vmatmul.mubr.msk.f32.vlgmr.msra.gmra.mrb[4].mxu0 %vm310_vm3, %v718_v4  ;;  %2489 = vmatpush3.bf16.msra.mxu1 %v3068_v33 }
 0x97c   :  { %2490 = vmatprep.subr.bf16.mxu1 %v2906_v0  ;;  %2501 = vmatpush3.bf16.msra.mxu0 %v3036_v7 }
 0x97d   :  { %2301 = vmatprep.mubr.msk.f32.mxu1 %vm2907_vm0, %v2908_v1  ;;  %2502 = vmatprep.subr.bf16.mxu0 %v2906_v0 }
 0x97e   :  { %2312 = vmatprep.mubr.msk.f32.mxu0 %vm2907_vm0, %v2908_v1 }
 0x97f   :  { %2492 = vmatpush3.bf16.msra.mxu1 %v3071_v35 }
 0x980   :  { %2493 = vmatprep.subr.bf16.mxu1 %v2906_v0  ;;  %2504 = vmatpush3.bf16.msra.mxu0 %v3043_v11 }
 0x981   :  { %2505 = vmatprep.subr.bf16.mxu0 %v2906_v0 }
 0x983   :  { %2495 = vmatpush3.bf16.msra.mxu1 %v3075_v38 }
 0x984   :  { %2496 = vmatprep.subr.bf16.mxu1 %v2906_v0 }
 0x987   :  { %2498 = vmatpush3.bf16.msra.mxu1 %v3080_v42 }
 0x988   :  { %2517 = vmatprep.subr.bf16.mxu1 %v2906_v0 }
 0xa4d   :  { %v886_v5 = vpop.f32.mrb[8].mxu1 }
 0xa4e   :  { %v887_v6 = vadd.f32 %v3060_v16, %v886_v5  ;;  %v788_v8 = vpop.f32.mrb[4].mxu0  ;;  %v2284_v9 = vpop.f32.mrb[9].mxu1 }
 0xa4f   :  { %v789_v10 = vadd.f32 %v3113_v48, %v788_v8  ;;  %v2273_v12 = vpop.f32.mrb[5].mxu0 }
 0xa50   :  { %2667 = vtanh.f32 %v887_v6  ;;  %v2006_v15 = vmul.f32 -1.442695, %v887_v6 }
 0xa51   :  { %2669 = vtanh.f32 %v789_v10  ;;  %v2004_v17 = vmul.f32 -1.442695, %v789_v10 }
 0xa52   :  { %2671 = vpow2.f32 %v2006_v15 }
 0xa53   :  { %2673 = vpow2.f32 %v2004_v17 }
 0xa5a   :  { %v2668_v13 = vpop.eup %2667 }
 0xa5b   :  { %v2670_v14 = vpop.eup %2669  ;;  %899 = vrot.lane.b32.xlu0 %v2668_v13, %s2909_s2 }
 0xa5c   :  { %801 = vrot.lane.b32.xlu1 %v2670_v14, %s2909_s2  ;;  %v2672_v18 = vpop.eup %2671 }
 0xa5d   :  { %v2674_v19 = vpop.eup %2673  ;;  %v893_v20 = vadd.f32 1.0, %v2672_v18 }
 0xa5e   :  { %v795_v21 = vadd.f32 1.0, %v2674_v19 }
 0xa5f   :  { %2675 = vrcp.f32 %v893_v20 }
 0xa60   :  { %2677 = vrcp.f32 %v795_v21 }
 0xa69   :  { %v2676_v22 = vpop.eup %2675 }
 0xa6a   :  { %v2678_v25 = vpop.eup %2677  ;;  %v897_v29 = vmul.f32 %v2676_v22, %v3158_v56 }
 0xa6b   :  { %v799_v31 = vmul.f32 %v2678_v25, %v3154_v53 }
 0xacd   :  { %v900_v24 = vpop.permute.xlu0 %899 }
 0xace   :  { %v902_v26 = vmul.f32 %v2676_v22, %v900_v24  ;;  %v802_v27 = vpop.permute.xlu1 %801 }
 0xacf   :  { %v804_v28 = vmul.f32 %v2678_v25, %v802_v27 }
 0xad0   :  { %904 = vrot.lane.b32.xlu0 %v902_v26, %s2910_s23 }
 0xad1   :  { %806 = vrot.lane.b32.xlu1 %v804_v28, %s2910_s23 }
 0xb42   :  { %v905_v30 = vpop.permute.xlu0 %904 }
 0xb43   :  { %v3196_v32 = vadd.f32 %v905_v30, %v897_v29  ;;  %v807_v34 = vpop.permute.xlu1 %806 }
 0xb44   :  { %v3198_v36 = vadd.f32 %v807_v34, %v799_v31 }
 0xb45   :  { %2679 = vtanh.f32 %v3196_v32 }
 0xb46   :  { %2681 = vtanh.f32 %v3198_v36 }
 0xb4f   :  { %v2680_v37 = vpop.eup %2679 }
 0xb50   :  { %v2682_v39 = vpop.eup %2681  ;;  %910 = vrot.lane.b32.xlu0 %v2680_v37, %s2909_s2 }
 0xb51   :  { %812 = vrot.lane.b32.xlu1 %v2682_v39, %s2909_s2 }
 0xbc2   :  { %v911_v40 = vpop.permute.xlu0 %910 }
 0xbc3   :  { %v913_v41 = vmul.f32 %v2676_v22, %v911_v40  ;;  %v813_v43 = vpop.permute.xlu1 %812 }
 0xbc4   :  { %v3204_v44 = vmul.f32 %v2678_v25, %v813_v43 }
 0xbc5   :  { %919 = vrot.lane.b32.xlu0 %v913_v41, %s2909_s2 }
 0xbc6   :  { %915 = vrot.lane.b32.xlu1 %v3204_v44, %s2910_s23 }
 0xbca   :  { %1020 = vrot.lane.b32.xlu1 %v913_v41, %s2910_s23 }
 0xc37   :  { %v920_v45 = vpop.permute.xlu0 %919 }
 0xc38   :  { %v916_v46 = vpop.permute.xlu1 %915 }
 0xc39   :  { %v922_v47 = vsel %vm201_vm2, %v916_v46, %v920_v45 }
 0xc3a   :  { %2302 = vmatmul.mubr.msk.f32.vlgmr.msra.gmra.mrb[10].mxu1 %vm310_vm3, %v922_v47 }
 0xc3b   :  { %2519 = vmatpush3.bf16.msra.mxu1 %v3036_v7  ;;  %2342 = vmatprep.mubr.msk.f32.mxu1 %vm2907_vm0, %v2908_v1 }
 0xc3c   :  { %v1021_v49 = vpop.permute.xlu1 %1020  ;;  %2520 = vmatprep.subr.bf16.mxu1 %v2906_v0 }
 0xc3d   :  { %2313 = vmatmul.mubr.msk.f32.vlgmr.msra.gmra.mrb[6].mxu0 %vm201_vm2, %v1021_v49 }
 0xc3e   :  { %2507 = vmatpush3.bf16.msra.mxu0 %v3068_v33  ;;  %2331 = vmatprep.mubr.msk.f32.mxu0 %vm2907_vm0, %v2908_v1 }
 0xc3f   :  { %2508 = vmatprep.subr.bf16.mxu0 %v2906_v0  ;;  %2522 = vmatpush3.bf16.msra.mxu1 %v3043_v11 }
 0xc40   :  { %2523 = vmatprep.subr.bf16.mxu1 %v2906_v0 }
 0xc42   :  { %2510 = vmatpush3.bf16.msra.mxu0 %v3071_v35 }
 0xc43   :  { %2511 = vmatprep.subr.bf16.mxu0 %v2906_v0 }
 0xc46   :  { %2513 = vmatpush3.bf16.msra.mxu0 %v3075_v38 }
 0xc47   :  { %2514 = vmatprep.subr.bf16.mxu0 %v2906_v0 }
 0xc4a   :  { %2516 = vmatpush3.bf16.msra.mxu0 %v3080_v42 }
 0xc4b   :  { %2535 = vmatprep.subr.bf16.mxu0 %v2906_v0 }
 0xd0d   :  { %v992_v50 = vpop.f32.mrb[10].mxu1 }
 0xd0e   :  { %v993_v51 = vadd.f32 %v3113_v48, %v992_v50  ;;  %v2303_v52 = vpop.f32.mrb[11].mxu1 }
 0xd10   :  { %2683 = vtanh.f32 %v993_v51  ;;  %v1090_v53 = vpop.f32.mrb[6].mxu0  ;;  %v2008_v58 = vmul.f32 -1.442695, %v993_v51 }
 0xd11   :  { %v1091_v54 = vadd.f32 %v3060_v16, %v1090_v53  ;;  %v2314_v55 = vpop.f32.mrb[7].mxu0 }
 0xd13   :  { %2685 = vtanh.f32 %v1091_v54  ;;  %v2010_v59 = vmul.f32 -1.442695, %v1091_v54 }
 0xd14   :  { %2687 = vpow2.f32 %v2008_v58 }
 0xd15   :  { %2689 = vpow2.f32 %v2010_v59 }
 0xd1a   :  { %v2684_v56 = vpop.eup %2683 }
 0xd1b   :  { %1005 = vrot.lane.b32.xlu0 %v2684_v56, %s2909_s2 }
 0xd1d   :  { %v2686_v57 = vpop.eup %2685 }
 0xd1e   :  { %1103 = vrot.lane.b32.xlu1 %v2686_v57, %s2909_s2  ;;  %v2688_v61 = vpop.eup %2687 }
 0xd1f   :  { %v2690_v62 = vpop.eup %2689  ;;  %v999_v63 = vadd.f32 1.0, %v2688_v61 }
 0xd20   :  { %v1097_v2 = vadd.f32 1.0, %v2690_v62 }
 0xd21   :  { %2691 = vrcp.f32 %v999_v63 }
 0xd22   :  { %2693 = vrcp.f32 %v1097_v2 }
 0xd2b   :  { %v2692_v3 = vpop.eup %2691 }
 0xd2c   :  { %v2694_v6 = vpop.eup %2693  ;;  %v1003_v10 = vmul.f32 %v2692_v3, %v3198_v36 }
 0xd2d   :  { %v1101_v14 = vmul.f32 %v2694_v6, %v3196_v32 }
 0xd8d   :  { %v1006_v4 = vpop.permute.xlu0 %1005 }
 0xd8e   :  { %v1008_v5 = vmul.f32 %v2692_v3, %v1006_v4 }
 0xd90   :  { %v1104_v8 = vpop.permute.xlu1 %1103  ;;  %1010 = vrot.lane.b32.xlu0 %v1008_v5, %s2910_s23 }
 0xd91   :  { %v1106_v9 = vmul.f32 %v2694_v6, %v1104_v8 }
 0xd93   :  { %1108 = vrot.lane.b32.xlu1 %v1106_v9, %s2910_s23 }
 0xe02   :  { %v1011_v12 = vpop.permute.xlu0 %1010 }
 0xe03   :  { %v3236_v13 = vadd.f32 %v1011_v12, %v1003_v10 }
 0xe05   :  { %2695 = vtanh.f32 %v3236_v13  ;;  %v1109_v15 = vpop.permute.xlu1 %1108 }
 0xe06   :  { %v3240_v17 = vadd.f32 %v1109_v15, %v1101_v14 }
 0xe08   :  { %2697 = vtanh.f32 %v3240_v17 }
 0xe0f   :  { %v2696_v18 = vpop.eup %2695 }
 0xe10   :  { %1016 = vrot.lane.b32.xlu0 %v2696_v18, %s2909_s2 }
 0xe12   :  { %v2698_v19 = vpop.eup %2697 }
 0xe13   :  { %1114 = vrot.lane.b32.xlu1 %v2698_v19, %s2909_s2 }
 0xe82   :  { %v1017_v20 = vpop.permute.xlu0 %1016 }
 0xe83   :  { %v3245_v21 = vmul.f32 %v2692_v3, %v1017_v20 }
 0xe85   :  { %v1115_v22 = vpop.permute.xlu1 %1114  ;;  %1119 = vrot.lane.b32.xlu0 %v3245_v21, %s2910_s23 }
 0xe86   :  { %v1117_v24 = vmul.f32 %v2694_v6, %v1115_v22 }
 0xe88   :  { %1123 = vrot.lane.b32.xlu1 %v1117_v24, %s2909_s2 }
 0xe89   :  { %1224 = vrot.lane.b32.xlu0 %v1117_v24, %s2910_s23 }
 0xef7   :  { %v1120_v25 = vpop.permute.xlu0 %1119 }
 0xefa   :  { %v1124_v26 = vpop.permute.xlu1 %1123 }
 0xefb   :  { %v1126_v27 = vsel %vm201_vm2, %v1120_v25, %v1124_v26  ;;  %v1225_v28 = vpop.permute.xlu0 %1224 }
 0xefc   :  { %2332 = vmatmul.mubr.msk.f32.vlgmr.msra.gmra.mrb[8].mxu0 %vm310_vm3, %v1126_v27  ;;  %2343 = vmatmul.mubr.msk.f32.vlgmr.msra.gmra.mrb[12].mxu1 %vm201_vm2, %v1225_v28 }
 0xefd   :  { %2525 = vmatpush3.bf16.msra.mxu1 %v3068_v33  ;;  %2537 = vmatpush3.bf16.msra.mxu0 %v3036_v7 }
 0xefe   :  { %2526 = vmatprep.subr.bf16.mxu1 %v2906_v0  ;;  %2361 = vmatprep.mubr.msk.f32.mxu1 %vm2907_vm0, %v2908_v1 }
 0xeff   :  { %2538 = vmatprep.subr.bf16.mxu0 %v2906_v0  ;;  %2372 = vmatprep.mubr.msk.f32.mxu0 %vm2907_vm0, %v2908_v1 }
 0xf01   :  { %2528 = vmatpush3.bf16.msra.mxu1 %v3071_v35  ;;  %2540 = vmatpush3.bf16.msra.mxu0 %v3043_v11 }
 0xf02   :  { %2529 = vmatprep.subr.bf16.mxu1 %v2906_v0  ;;  %2541 = vmatprep.subr.bf16.mxu0 %v2906_v0 }
 0xf05   :  { %2531 = vmatpush3.bf16.msra.mxu1 %v3075_v38 }
 0xf06   :  { %2532 = vmatprep.subr.bf16.mxu1 %v2906_v0 }
 0xf09   :  { %2534 = vmatpush3.bf16.msra.mxu1 %v3080_v42 }
 0xf0a   :  { %2553 = vmatprep.subr.bf16.mxu1 %v2906_v0 }
 0xfcf   :  { %v1196_v29 = vpop.f32.mrb[8].mxu0  ;;  %v1294_v30 = vpop.f32.mrb[12].mxu1 }
 0xfd0   :  { %v1197_v31 = vadd.f32 %v3113_v48, %v1196_v29  ;;  %v1295_v32 = vadd.f32 %v3060_v16, %v1294_v30  ;;  %v2333_v34 = vpop.f32.mrb[9].mxu0  ;;  %v2344_v36 = vpop.f32.mrb[13].mxu1 }
 0xfd2   :  { %2699 = vtanh.f32 %v1197_v31  ;;  %v2012_v40 = vmul.f32 -1.442695, %v1197_v31  ;;  %v2014_v41 = vmul.f32 -1.442695, %v1295_v32 }
 0xfd3   :  { %2701 = vtanh.f32 %v1295_v32 }
 0xfd4   :  { %2703 = vpow2.f32 %v2012_v40 }
 0xfd5   :  { %2705 = vpow2.f32 %v2014_v41 }
 0xfdc   :  { %v2700_v37 = vpop.eup %2699 }
 0xfdd   :  { %v2702_v39 = vpop.eup %2701  ;;  %1209 = vrot.lane.b32.xlu1 %v2700_v37, %s2909_s2 }
 0xfde   :  { %1307 = vrot.lane.b32.xlu0 %v2702_v39, %s2909_s2  ;;  %v2704_v43 = vpop.eup %2703 }
 0xfdf   :  { %v2706_v45 = vpop.eup %2705  ;;  %v1203_v46 = vadd.f32 1.0, %v2704_v43 }
 0xfe0   :  { %v1301_v47 = vadd.f32 1.0, %v2706_v45 }
 0xfe1   :  { %2707 = vrcp.f32 %v1203_v46 }
 0xfe2   :  { %2709 = vrcp.f32 %v1301_v47 }
 0xfeb   :  { %v2708_v49 = vpop.eup %2707 }
 0xfec   :  { %v2710_v51 = vpop.eup %2709  ;;  %v1207_v55 = vmul.f32 %v2708_v49, %v3236_v13 }
 0xfed   :  { %v1305_v57 = vmul.f32 %v2710_v51, %v3240_v17 }
0x104f   :  { %v1210_v50 = vpop.permute.xlu1 %1209 }
0x1050   :  { %v1212_v52 = vmul.f32 %v2708_v49, %v1210_v50  ;;  %v1308_v53 = vpop.permute.xlu0 %1307 }
0x1051   :  { %v1310_v54 = vmul.f32 %v2710_v51, %v1308_v53 }
0x1052   :  { %1214 = vrot.lane.b32.xlu1 %v1212_v52, %s2910_s23 }
0x1053   :  { %1312 = vrot.lane.b32.xlu0 %v1310_v54, %s2910_s23 }
0x10c4   :  { %v1215_v56 = vpop.permute.xlu1 %1214 }
0x10c5   :  { %v3278_v58 = vadd.f32 %v1215_v56, %v1207_v55  ;;  %v1313_v59 = vpop.permute.xlu0 %1312 }
0x10c6   :  { %v3280_v61 = vadd.f32 %v1313_v59, %v1305_v57 }
0x10c7   :  { %2711 = vtanh.f32 %v3278_v58 }
0x10c8   :  { %2713 = vtanh.f32 %v3280_v61 }
0x10d1   :  { %v2712_v62 = vpop.eup %2711 }
0x10d2   :  { %v2714_v63 = vpop.eup %2713  ;;  %1220 = vrot.lane.b32.xlu1 %v2712_v62, %s2909_s2 }
0x10d3   :  { %1318 = vrot.lane.b32.xlu0 %v2714_v63, %s2909_s2 }
0x1144   :  { %v1221_v2 = vpop.permute.xlu1 %1220 }
0x1145   :  { %v1223_v3 = vmul.f32 %v2708_v49, %v1221_v2  ;;  %v1319_v4 = vpop.permute.xlu0 %1318 }
0x1146   :  { %v1321_v5 = vmul.f32 %v2710_v51, %v1319_v4 }
0x1147   :  { %1323 = vrot.lane.b32.xlu1 %v1223_v3, %s2910_s23 }
0x1148   :  { %1327 = vrot.lane.b32.xlu0 %v1321_v5, %s2909_s2 }
0x114b   :  { %1428 = vrot.lane.b32.xlu1 %v1321_v5, %s2910_s23 }
0x11b9   :  { %v3289_v6 = vpop.permute.xlu1 %1323 }
0x11ba   :  { %v1328_v8 = vpop.permute.xlu0 %1327 }
0x11bb   :  { %v1330_v9 = vsel %vm201_vm2, %v3289_v6, %v1328_v8 }
0x11bc   :  { %2362 = vmatmul.mubr.msk.f32.vlgmr.msra.gmra.mrb[14].mxu1 %vm310_vm3, %v1330_v9 }
0x11bd   :  { %v1429_v10 = vpop.permute.xlu1 %1428  ;;  %2555 = vmatpush3.bf16.msra.mxu1 %v3036_v7  ;;  %2402 = vmatprep.mubr.msk.f32.mxu1 %vm2907_vm0, %v2908_v1 }
0x11be   :  { %2373 = vmatmul.mubr.msk.f32.vlgmr.msra.gmra.mrb[10].mxu0 %vm201_vm2, %v1429_v10  ;;  %2556 = vmatprep.subr.bf16.mxu1 %v2906_v0 }
0x11bf   :  { %2543 = vmatpush3.bf16.msra.mxu0 %v3068_v33  ;;  %2391 = vmatprep.mubr.msk.f32.mxu0 %vm2907_vm0, %v2908_v1 }
0x11c0   :  { %2544 = vmatprep.subr.bf16.mxu0 %v2906_v0 }
0x11c1   :  { %2558 = vmatpush3.bf16.msra.mxu1 %v3043_v11 }
0x11c2   :  { %2559 = vmatprep.subr.bf16.mxu1 %v2906_v0 }
0x11c3   :  { %2546 = vmatpush3.bf16.msra.mxu0 %v3071_v35 }
0x11c4   :  { %2547 = vmatprep.subr.bf16.mxu0 %v2906_v0 }
0x11c7   :  { %2549 = vmatpush3.bf16.msra.mxu0 %v3075_v38 }
0x11c8   :  { %2550 = vmatprep.subr.bf16.mxu0 %v2906_v0 }
0x11cb   :  { %2552 = vmatpush3.bf16.msra.mxu0 %v3080_v42 }
0x128f   :  { %v1400_v7 = vpop.f32.mrb[14].mxu1 }
0x1290   :  { %v1401_v12 = vadd.f32 %v3113_v48, %v1400_v7  ;;  %v2363_v13 = vpop.f32.mrb[15].mxu1 }
0x1291   :  { %v1498_v14 = vpop.f32.mrb[10].mxu0 }
0x1292   :  { %2715 = vtanh.f32 %v1401_v12  ;;  %v1499_v11 = vadd.f32 %v3060_v16, %v1498_v14  ;;  %v2374_v15 = vpop.f32.mrb[11].mxu0  ;;  %v2016_v19 = vmul.f32 -1.442695, %v1401_v12 }
0x1294   :  { %2717 = vtanh.f32 %v1499_v11  ;;  %v2018_v20 = vmul.f32 -1.442695, %v1499_v11 }
0x1295   :  { %2719 = vpow2.f32 %v2016_v19 }
0x1296   :  { %2721 = vpow2.f32 %v2018_v20 }
0x129c   :  { %v2716_v17 = vpop.eup %2715 }
0x129d   :  { %1413 = vrot.lane.b32.xlu0 %v2716_v17, %s2909_s2 }
0x129e   :  { %v2718_v18 = vpop.eup %2717 }
0x129f   :  { %1511 = vrot.lane.b32.xlu1 %v2718_v18, %s2909_s2  ;;  %v2720_v22 = vpop.eup %2719 }
0x12a0   :  { %v2722_v24 = vpop.eup %2721  ;;  %v1407_v25 = vadd.f32 1.0, %v2720_v22 }
0x12a1   :  { %v1505_v26 = vadd.f32 1.0, %v2722_v24 }
0x12a2   :  { %2723 = vrcp.f32 %v1407_v25 }
0x12a3   :  { %2725 = vrcp.f32 %v1505_v26 }
0x12ac   :  { %v2724_v27 = vpop.eup %2723 }
0x12ad   :  { %v2726_v30 = vpop.eup %2725  ;;  %v1411_v34 = vmul.f32 %v2724_v27, %v3278_v58 }
0x12ae   :  { %v1509_v39 = vmul.f32 %v2726_v30, %v3280_v61 }
0x130f   :  { %v1414_v28 = vpop.permute.xlu0 %1413 }
0x1310   :  { %v1416_v29 = vmul.f32 %v2724_v27, %v1414_v28 }
0x1311   :  { %v1512_v31 = vpop.permute.xlu1 %1511 }
0x1312   :  { %1418 = vrot.lane.b32.xlu0 %v1416_v29, %s2910_s23  ;;  %v1514_v32 = vmul.f32 %v2726_v30, %v1512_v31 }
0x1314   :  { %1516 = vrot.lane.b32.xlu1 %v1514_v32, %s2910_s23 }
0x1384   :  { %v1419_v36 = vpop.permute.xlu0 %1418 }
0x1385   :  { %v1421_v37 = vadd.f32 %v1419_v36, %v1411_v34 }
0x1386   :  { %v1517_v40 = vpop.permute.xlu1 %1516 }
0x1387   :  { %2727 = vtanh.f32 %v1421_v37  ;;  %v1519_v41 = vadd.f32 %v1517_v40, %v1509_v39  ;;  %v1871_v39 = vld [vmem:[#allocation10 + $0x80] sm:$0xff]  ;;  %v1872_v40 = vld [vmem:[#allocation10 + $0x88] sm:$0xff] }
0x1389   :  { %2729 = vtanh.f32 %v1519_v41 }
0x1391   :  { %v2728_v43 = vpop.eup %2727 }
0x1392   :  { %1424 = vrot.lane.b32.xlu0 %v2728_v43, %s2909_s2  ;;  %v2571_v43 = vpack.c.bf16 %v1872_v40, %v1871_v39 }
0x1393   :  { %v2730_v45 = vpop.eup %2729 }
0x1394   :  { %1522 = vrot.lane.b32.xlu1 %v2730_v45, %s2909_s2  ;;  %v1856_v45 = vld [vmem:[#allocation10 + $0x8] sm:$0xff]  ;;  %2572 = vmatprep.subr.bf16.mxu0 %v2571_v43 }
0x1404   :  { %v1425_v46 = vpop.permute.xlu0 %1424 }
0x1405   :  { %v3320_v47 = vmul.f32 %v2724_v27, %v1425_v46  ;;  %v1873_v46 = vld [vmem:[#allocation10 + $0x90] sm:$0xff] }
0x1406   :  { %v1523_v49 = vpop.permute.xlu1 %1522 }
0x1407   :  { %1527 = vrot.lane.b32.xlu0 %v3320_v47, %s2910_s23  ;;  %v1525_v50 = vmul.f32 %v2726_v30, %v1523_v49  ;;  %v1874_v49 = vld [vmem:[#allocation10 + $0x98] sm:$0xff] }
0x1409   :  { %1531 = vrot.lane.b32.xlu1 %v1525_v50, %s2909_s2 }
0x140b   :  { %1632 = vrot.lane.b32.xlu0 %v1525_v50, %s2910_s23 }
0x1479   :  { %v1528_v51 = vpop.permute.xlu0 %1527 }
0x147b   :  { %v1532_v52 = vpop.permute.xlu1 %1531 }
0x147c   :  { %v1534_v53 = vsel %vm201_vm2, %v1528_v51, %v1532_v52  ;;  %v2575_v51 = vpack.c.bf16 %v1874_v49, %v1873_v46  ;;  %v1857_v52 = vld [vmem:[#allocation10 + $0x10] sm:$0xff] }
0x147d   :  { %v1633_v54 = vpop.permute.xlu0 %1632  ;;  %2392 = vmatmul.mubr.msk.f32.vlgmr.msra.gmra.mrb[12].mxu0 %vm310_vm3, %v1534_v53  ;;  %v1858_v53 = vld [vmem:[#allocation10 + $0x18] sm:$0xff] }
0x147e   :  { %2403 = vmatmul.mubr.msk.f32.vlgmr.msra.gmra.mrb[16].mxu1 %vm201_vm2, %v1633_v54  ;;  %v1875_v54 = vld [vmem:[#allocation10 + $0xa0] sm:$0xff] }
0x147f   :  { %2561 = vmatpush3.bf16.msra.mxu1 %v3068_v33  ;;  %2421 = vmatprep.mubr.msk.f32.mxu1 %vm2907_vm0, %v2908_v1 }
0x1480   :  { %2562 = vmatprep.subr.bf16.mxu1 %v2906_v0 }
0x1483   :  { %2564 = vmatpush3.bf16.msra.mxu1 %v3071_v35 }
0x1484   :  { %2565 = vmatprep.subr.bf16.mxu1 %v2906_v0 }
0x1487   :  { %2567 = vmatpush3.bf16.msra.mxu1 %v3075_v38 }
0x1488   :  { %2568 = vmatprep.subr.bf16.mxu1 %v2906_v0 }
0x148b   :  { %2570 = vmatpush3.bf16.msra.mxu1 %v3080_v42 }
0x1550   :  { %v1604_v55 = vpop.f32.mrb[12].mxu0 }
0x1551   :  { %v1702_v56 = vpop.f32.mrb[16].mxu1  ;;  %v1605_v57 = vadd.f32 %v3113_v48, %v1604_v55  ;;  %v2393_v58 = vpop.f32.mrb[13].mxu0  ;;  %v1876_v55 = vld [vmem:[#allocation10 + $0xa8] sm:$0xff] }
0x1552   :  { %v1703_v33 = vadd.f32 %v3060_v16, %v1702_v56  ;;  %v2404_v1 = vpop.f32.mrb[17].mxu1  ;;  %v2577_v56 = vpack.c.bf16 %v1858_v53, %v1857_v52  ;;  %v1878_v58 = vld [vmem:[#allocation10 + $0xb8] sm:$0xff] }
0x1553   :  { %2731 = vtanh.f32 %v1605_v57  ;;  %v2020_v38 = vmul.f32 -1.442695, %v1605_v57  ;;  %v1860_v57 = vld [vmem:[#allocation10 + $0x28] sm:$0xff] }
0x1554   :  { %2733 = vtanh.f32 %v1703_v33  ;;  %v2022_v0 = vmul.f32 -1.442695, %v1703_v33  ;;  %v1877_v33 = vld [vmem:[#allocation10 + $0xb0] sm:$0xff] }
0x1555   :  { %2735 = vpow2.f32 %v2020_v38  ;;  %v1862_v38 = vld [vmem:[#allocation10 + $0x38] sm:$0xff] }
0x1556   :  { %2737 = vpow2.f32 %v2022_v0  ;;  %v1879_v0 = vld [vmem:[#allocation10 + $0xc0] sm:$0xff] }
0x155d   :  { %v2732_v59 = vpop.eup %2731 }
0x155e   :  { %v2734_v35 = vpop.eup %2733  ;;  %1617 = vrot.lane.b32.xlu1 %v2732_v59, %s2909_s2  ;;  %v2583_v59 = vpack.c.bf16 %v1878_v58, %v1877_v33 }
0x155f   :  { %1715 = vrot.lane.b32.xlu0 %v2734_v35, %s2909_s2  ;;  %v2736_v42 = vpop.eup %2735  ;;  %v1861_v35 = vld [vmem:[#allocation10 + $0x30] sm:$0xff] }
0x1560   :  { %v2738_v61 = vpop.eup %2737  ;;  %v1611_v62 = vadd.f32 1.0, %v2736_v42  ;;  %v1880_v42 = vld [vmem:[#allocation10 + $0xc8] sm:$0xff] }
0x1561   :  { %v1709_v63 = vadd.f32 1.0, %v2738_v61  ;;  %v2585_v61 = vpack.c.bf16 %v1862_v38, %v1861_v35 }
0x1562   :  { %2739 = vrcp.f32 %v1611_v62  ;;  %v2587_v62 = vpack.c.bf16 %v1880_v42, %v1879_v0 }
0x1563   :  { %2741 = vrcp.f32 %v1709_v63  ;;  %v1863_v63 = vld [vmem:[#allocation10 + $0x40] sm:$0xff] }
0x156c   :  { %v2740_v16 = vpop.eup %2739 }
0x156d   :  { %v2742_v3 = vpop.eup %2741  ;;  %v1615_v9 = vmul.f32 %v2740_v16, %v1421_v37 }
0x156e   :  { %v1713_v7 = vmul.f32 %v2742_v3, %v1519_v41  ;;  %v1855_v41 = vld [vmem:[#allocation10] sm:$0xff] }
0x156f   :  { %v2573_v50 = vpack.c.bf16 %v1856_v45, %v1855_v41 }
0x1571   :  { %2574 = vmatpush3.bf16.msra.mxu0 %v2573_v50 }
0x1572   :  { %2576 = vmatprep.subr.bf16.mxu0 %v2575_v51  ;;  %v2025_v51 = vld [vmem:[%s3400_s7] ss:$0 sm:$0xff] }
0x1575   :  { %2578 = vmatpush3.bf16.msra.mxu0 %v2577_v56 }
0x15d0   :  { %v1618_v2 = vpop.permute.xlu1 %1617 }
0x15d1   :  { %v1620_v4 = vmul.f32 %v2740_v16, %v1618_v2  ;;  %v1716_v5 = vpop.permute.xlu0 %1715  ;;  %v1881_v2 = vld [vmem:[#allocation10 + $0xd0] sm:$0xff] }
0x15d2   :  { %v1718_v8 = vmul.f32 %v2742_v3, %v1716_v5 }
0x15d3   :  { %1622 = vrot.lane.b32.xlu1 %v1620_v4, %s2910_s23 }
0x15d4   :  { %1720 = vrot.lane.b32.xlu0 %v1718_v8, %s2910_s23  ;;  %v1865_v8 = vld [vmem:[#allocation10 + $0x50] sm:$0xff] }
0x1645   :  { %v1623_v10 = vpop.permute.xlu1 %1622 }
0x1646   :  { %v3344_v12 = vadd.f32 %v1623_v10, %v1615_v9  ;;  %v1721_v13 = vpop.permute.xlu0 %1720  ;;  %v1866_v9 = vld [vmem:[#allocation10 + $0x58] sm:$0xff] }
0x1647   :  { %v1723_v14 = vadd.f32 %v1721_v13, %v1713_v7  ;;  %v2593_v10 = vpack.c.bf16 %v1866_v9, %v1865_v8  ;;  %v1883_v13 = vld [vmem:[#allocation10 + $0xe0] sm:$0xff] }
0x1648   :  { %2743 = vtanh.f32 %v3344_v12 }
0x1649   :  { %2745 = vtanh.f32 %v1723_v14  ;;  %v1884_v14 = vld [vmem:[#allocation10 + $0xe8] sm:$0xff] }
0x1652   :  { %v2744_v11 = vpop.eup %2743 }
0x1653   :  { %v2746_v15 = vpop.eup %2745  ;;  %1628 = vrot.lane.b32.xlu1 %v2744_v11, %s2909_s2 }
0x1654   :  { %1726 = vrot.lane.b32.xlu0 %v2746_v15, %s2909_s2  ;;  %v2595_v15 = vpack.c.bf16 %v1884_v14, %v1883_v13 }
0x16c5   :  { %v1629_v17 = vpop.permute.xlu1 %1628 }
0x16c6   :  { %v3349_v18 = vmul.f32 %v2740_v16, %v1629_v17  ;;  %v1727_v19 = vpop.permute.xlu0 %1726  ;;  %v1864_v16 = vld [vmem:[#allocation10 + $0x48] sm:$0xff]  ;;  %v1867_v17 = vld [vmem:[#allocation10 + $0x60] sm:$0xff] }
0x16c7   :  { %v1729_v20 = vmul.f32 %v2742_v3, %v1727_v19  ;;  %v1882_v3 = vld [vmem:[#allocation10 + $0xd8] sm:$0xff]  ;;  %v2589_v4 = vpack.c.bf16 %v1864_v16, %v1863_v63  ;;  %v1868_v19 = vld [vmem:[#allocation10 + $0x68] sm:$0xff] }
0x16c8   :  { %1731 = vrot.lane.b32.xlu1 %v3349_v18, %s2910_s23  ;;  %v2591_v5 = vpack.c.bf16 %v1882_v3, %v1881_v2 }
0x16c9   :  { %1735 = vrot.lane.b32.xlu0 %v1729_v20, %s2909_s2 }
0x173a   :  { %v1732_v22 = vpop.permute.xlu1 %1731 }
0x173b   :  { %v1736_v24 = vpop.permute.xlu0 %1735 }
0x173c   :  { %v1738_v25 = vsel %vm201_vm2, %v1732_v22, %v1736_v24  ;;  %v2597_v22 = vpack.c.bf16 %v1868_v19, %v1867_v17  ;;  %v1885_v24 = vld [vmem:[#allocation10 + $0xf0] sm:$0xff] }
0x173d   :  { %2422 = vmatmul.mubr.msk.f32.vlgmr.msra.gmra.mrb[18].mxu1 %vm310_vm3, %v1738_v25  ;;  %v1886_v25 = vld [vmem:[#allocation10 + $0xf8] sm:$0xff] }
0x1810   :  { %v1808_v26 = vpop.f32.mrb[18].mxu1 }
0x1811   :  { %v1809_v27 = vadd.f32 %v3113_v48, %v1808_v26  ;;  %v2423_v28 = vpop.f32.mrb[19].mxu1  ;;  %v2617_v48 = vpack.i.bf16 %v3163_v60, %v3320_v47  ;;  %v2579_v60 = vpack.c.bf16 %v1876_v55, %v1875_v54  ;;  %v1859_v47 = vld [vmem:[#allocation10 + $0x20] sm:$0xff]  ;;  %v2599_v26 = vpack.c.bf16 %v1886_v25, %v1885_v24 }
0x1812   :  { %v2581_v1 = vpack.c.bf16 %v1860_v57, %v1859_v47  ;;  %v1870_v28 = vld [vmem:[#allocation10 + $0x78] sm:$0xff] }
0x1813   :  { %2747 = vtanh.f32 %v1809_v27  ;;  %v2024_v30 = vmul.f32 -1.442695, %v1809_v27  ;;  %2580 = vmatprep.subr.bf16.mxu0 %v2579_v60  ;;  %v1869_v27 = vld [vmem:[#allocation10 + $0x70] sm:$0xff] }
0x1814   :  { %2582 = vmatpush3.bf16.msra.mxu0 %v2581_v1 }
0x1815   :  { %2749 = vpow2.f32 %v2024_v30  ;;  %2584 = vmatprep.subr.bf16.mxu0 %v2583_v59  ;;  %v2622_v30 = vpack.i.bf16 %v3204_v44, %v3349_v18 }
0x1818   :  { %2586 = vmatpush3.bf16.msra.mxu0 %v2585_v61 }
0x1819   :  { %2588 = vmatprep.subr.bf16.mxu0 %v2587_v62 }
0x181c   :  { %2590 = vmatpush3.bf16.msra.mxu0 %v2589_v4 }
0x181d   :  { %v2748_v29 = vpop.eup %2747  ;;  %2592 = vmatprep.subr.bf16.mxu0 %v2591_v5 }
0x181e   :  { %1821 = vrot.lane.b32.xlu1 %v2748_v29, %s2909_s2  ;;  %v2601_v29 = vpack.c.bf16 %v1870_v28, %v1869_v27 }
0x181f   :  { %v2750_v31 = vpop.eup %2749 }
0x1820   :  { %v1815_v32 = vadd.f32 1.0, %v2750_v31  ;;  %2594 = vmatpush3.bf16.msra.mxu0 %v2593_v10 }
0x1821   :  { %2596 = vmatprep.subr.bf16.mxu0 %v2595_v15 }
0x1822   :  { %2751 = vrcp.f32 %v1815_v32 }
0x1824   :  { %2598 = vmatpush3.bf16.msra.mxu0 %v2597_v22 }
0x1825   :  { %2600 = vmatprep.subr.bf16.mxu0 %v2599_v26 }
0x1828   :  { %2602 = vmatpush3.bf16.msra.mxu0 %v2601_v29 }
0x182c   :  { %v3358_v34 = vpop.eup %2751 }
0x182d   :  { %v1819_v7 = vmul.f32 %v3358_v34, %v3344_v12 }
0x1890   :  { %v1822_v36 = vpop.permute.xlu1 %1821 }
0x1891   :  { %v1824_v37 = vmul.f32 %v3358_v34, %v1822_v36 }
0x1893   :  { %1826 = vrot.lane.b32.xlu0 %v1824_v37, %s2910_s23 }
0x1897   :  { %2618 = vrot.lane.b32.xlu0 %v2617_v48, %s2909_s2 }
0x1905   :  { %v1827_v11 = vpop.permute.xlu0 %1826 }
0x1906   :  { %v1829_v20 = vadd.f32 %v1827_v11, %v1819_v7 }
0x1908   :  { %2753 = vtanh.f32 %v1829_v20 }
0x1909   :  { %v2619_v31 = vpop.permute.xlu0 %2618 }
0x190a   :  { %v2621_v36 = vunpack.i.h.bf16 %v2619_v31  ;;  %v2620_v37 = vunpack.i.l.bf16 %v2619_v31 }
0x190c   :  { %v1848_v41 = vsel %vm201_vm2, %v3130_v23, %v2621_v36  ;;  %v1852_v43 = vsel %vm201_vm2, %v3289_v6, %v2620_v37 }
0x1912   :  { %v2754_v12 = vpop.eup %2753 }
0x1913   :  { %1832 = vrot.lane.b32.xlu1 %v2754_v12, %s2909_s2 }
0x1917   :  { %2623 = vrot.lane.b32.xlu1 %v2622_v30, %s2911_s4 }
0x1985   :  { %v1833_v32 = vpop.permute.xlu1 %1832 }
0x1986   :  { %v1835_v45 = vmul.f32 %v3358_v34, %v1833_v32 }
0x1989   :  { %v2624_v48 = vpop.permute.xlu1 %2623 }
0x198a   :  { %v2626_v39 = vunpack.i.h.bf16 %v2624_v48  ;;  %v2625_v40 = vunpack.i.l.bf16 %v2624_v48 }
0x198c   :  { %v1849_v44 = vsel %vm310_vm3, %v1848_v41, %v2626_v39  ;;  %v1853_v18 = vsel %vm310_vm3, %v1852_v43, %v2625_v40 }
0x198d   :  { %v1854_v46 = vsel %vm1850_vm4, %v1853_v18, %v1835_v45  ;;  %v1851_v49 = vsel %vm1850_vm4, %v1849_v44, %v3245_v21 }
0x198e   :  { %1958 = vmatprep.mubr.f32.mxu0 %v1854_v46 }
0x198f   :  { %1959 = vmatmul.mubr.f32.vlgmr.msra.gmra.mrb[14].mxu0 %v1851_v49 }
0x1a62   :  { %v2174_v50 = vpop.f32.mrb[14].mxu0 }
0x1a63   :  { %v2175_v23 = vpop.f32.mrb[15].mxu0 }
0x1a64   :  { %v2176_v52 = vadd.f32 %v2175_v23, %v2174_v50 }
0x1a66   :  { %v1961_v53 = vadd.f32 %v2176_v52, %v2025_v51 }
0x1a68   :  { %v2026_v6 = vmul.f32 -1.442695, %v1961_v53 }
0x1a6a   :  { %2755 = vpow2.f32 %v2026_v6 }
0x1a74   :  { %v2756_v34 = vpop.eup %2755 }
0x1a75   :  { %v1967_v54 = vadd.f32 1.0, %v2756_v34 }
0x1a77   :  { %2757 = vrcp.f32 %v1967_v54 }
0x1a81   :  { %v2758_v55 = vpop.eup %2757 }
0x1a82   :  { %1970 = vst [vmem:[#allocation11] sm:$0xff] %v2758_v55 }
0x1a83   :  { %2880 = shalt.err (!%p2877_p2)
}
0x1a84   :  { %s2881_s9 = scalar_lea.hbm %s3401_s8, 128 }
0x1a85   :  { %p2882_p3 = scmp.ne.s32.totalorder %s3401_s8, %s2881_s9  ;;  %p2885_p4 = scmp.lt.u32.totalorder %s2881_s9, %s3401_s8 }
0x1a87   :  { %p2887_p5 = pnand %p2885_p4, %p2882_p3 }
0x1a89   :  { %2890 = shalt.err (!%p2887_p5)
}
0x1a8a   :  { %1980 = dma.vmem_to_hbm [thread:$0]  %s1978_s30, 128, %s3401_s8, [#allocation4]  }
0x1a8b   :  { %2897 = dma.done.wait [#allocation4], 128  }
0x1a8c   :  { %2898 = vsyncadd [#allocation4], 4294967168 }
0x1a8d   :  { %1984 = vsyncpa [#allocation3], 1 }
0x1a8e   :  { %1985 = vsyncpa [#allocation6], 1 }
0x1a8f   :  { %1986 = vsyncpa [#allocation9], 1 }
0x1a90   :  { %1987 = vsyncpa [#allocation4], 1 }

</bundles_post_ra>
